<compile_context>
chip_gen: v5e
topology: v5e:2x2
jax: 0.10.0
libtpu: 0.0.40
codegen_flags: <defaults>
</compile_context>

<pallas_src>
import functools
import numpy as np
import jax
import jax.numpy as jnp
from jax.experimental import pallas as pl
from jax.experimental.pallas import tpu as pltpu


def _rel_rotate_kernel(rels_s,                        # scalar-prefetch (SMEM)
                       w_ref, day_ref,                # BlockSpec-pipelined inputs
                       rel1_hbm, rel2_hbm,            # full tables in HBM (pl.ANY)
                       rr_out, ri_out,                # outputs, (tb, d) tiles
                       r1_buf, r2_buf, sem,           # VMEM scratch + DMA sems
                       *, tb):
    i = pl.program_id(0)
    base = i * tb

    # Issue 2*tb single-row gather DMAs for this batch tile (all concurrent).
    copies = []
    for j in range(tb):
        r = rels_s[base + j]
        c1 = pltpu.make_async_copy(rel1_hbm.at[pl.ds(r, 1)],
                                   r1_buf.at[pl.ds(j, 1)], sem.at[0, j])
        c2 = pltpu.make_async_copy(rel2_hbm.at[pl.ds(r, 1)],
                                   r2_buf.at[pl.ds(j, 1)], sem.at[1, j])
        c1.start()
        c2.start()
        copies.append(c1)
        copies.append(c2)

    # Overlap the gather latency with the temporal phase (EUP work, no data
    # dependency on the DMAs).  (1, d) * (tb, 1) broadcasts to a full tile.
    phase = w_ref[...] * day_ref[...]
    d_img = jnp.sin(phase)
    d_real = jnp.cos(phase)

    for c in copies:
        c.wait()

    r1 = r1_buf[...]                                  # rel1[rels[tile]]
    r2 = r2_buf[...]                                  # rel2[rels[tile]]
    # Complex rotation of the relation embeddings by the temporal phase.
    rr_out[...] = d_real * r1 - d_img * r2            # rels_embeds_real
    ri_out[...] = d_real * r2 + d_img * r1            # rels_embeds_img


def noname_forward(heads, rels, tails, day, params, *, tb=None):
    """JAX/Pallas equivalent of NoName.forward.

    heads/rels/tails: int32 [bs]; day: float [bs].
    Returns (heads_real, rels_real, tails_real, heads_img, rels_img, tails_img),
    each [bs, d_model] float32.
    """
    ent1, ent2 = params["ent1"], params["ent2"]
    rel1, rel2, w = params["rel1"], params["rel2"], params["w"]
    bs = heads.shape[0]
    d = w.shape[0]
    if tb is None:
        tb = 8 if bs <= 128 else 32               # review: >=8, ideally 16-32

    # ---- pass-through entity embeddings: plain gathers, outside the kernel ----
    heads_real = jnp.take(ent1, heads, axis=0)
    tails_real = jnp.take(ent1, tails, axis=0)
    heads_img = jnp.take(ent2, heads, axis=0)
    tails_img = jnp.take(ent2, tails, axis=0)

    # ---- relation path: fused gather + temporal rotation in Pallas ----
    bs_pad = tb * pl.cdiv(bs, tb)                 # pad batch to a tile multiple
    pad = bs_pad - bs
    rels_p = jnp.pad(rels.astype(jnp.int32), (0, pad))
    day_p = jnp.pad(day.astype(jnp.float32), (0, pad)).reshape(bs_pad, 1)
    w2d = w.reshape(1, d).astype(jnp.float32)

    grid_spec = pltpu.PrefetchScalarGridSpec(
        num_scalar_prefetch=1,                    # rels indices -> SMEM
        grid=(bs_pad // tb,),
        in_specs=[
            pl.BlockSpec((1, d), lambda i, rels_s: (0, 0)),    # w (broadcast)
            pl.BlockSpec((tb, 1), lambda i, rels_s: (i, 0)),   # day tile
            pl.BlockSpec(memory_space=pl.ANY),                 # rel1 table (HBM)
            pl.BlockSpec(memory_space=pl.ANY),                 # rel2 table (HBM)
        ],
        out_specs=[pl.BlockSpec((tb, d), lambda i, rels_s: (i, 0)),
                   pl.BlockSpec((tb, d), lambda i, rels_s: (i, 0))],
        scratch_shapes=[
            pltpu.VMEM((tb, d), jnp.float32),     # gathered rel1 rows
            pltpu.VMEM((tb, d), jnp.float32),     # gathered rel2 rows
            pltpu.SemaphoreType.DMA((2, tb)),     # one sem per row copy
        ],
    )
    rr, ri = pl.pallas_call(
        functools.partial(_rel_rotate_kernel, tb=tb),
        out_shape=(jax.ShapeDtypeStruct((bs_pad, d), jnp.float32),
                   jax.ShapeDtypeStruct((bs_pad, d), jnp.float32)),
        grid_spec=grid_spec,
        compiler_params=pltpu.CompilerParams(
            dimension_semantics=("parallel",)),   # disjoint tiles, no carry
    )(rels_p, w2d, day_p, rel1, rel2)

    rels_real = rr[:bs]
    rels_img = ri[:bs]
    return (heads_real, rels_real, tails_real,
            heads_img, rels_img, tails_img)


def make_params(n_ent, n_rel, d_model, key):
    """Deterministic synthetic parameters (matches shapes in NoName.__init__)."""
    k1, k2, k3, k4 = jax.random.split(key, 4)
    params = {
        "ent1": jax.random.normal(k1, (n_ent, d_model), jnp.float32) * 0.1,
        "ent2": jax.random.normal(k2, (n_ent, d_model), jnp.float32) * 0.1,
        "rel1": jax.random.normal(k3, (n_rel, d_model), jnp.float32) * 0.1,
        "rel2": jax.random.normal(k4, (n_rel, d_model), jnp.float32) * 0.1,
        # self.w = 1 / 10 ** np.linspace(0, 9, d_model)
        "w": jnp.asarray(1.0 / 10.0 ** np.linspace(0.0, 9.0, d_model),
                         dtype=jnp.float32),
    }
    return params
    # TODO(synk): GraphEmbedding's internal dropout (train-time only) is omitted;
    # get_*_embedding at inference is a plain table lookup, which is what we do.


def _reference(heads, rels, tails, day, params):
    w = params["w"][None, :]
    day = day.astype(jnp.float32)[:, None]
    d_img = jnp.sin(w * day)
    d_real = jnp.cos(w * day)
    r1 = params["rel1"][rels]
    r2 = params["rel2"][rels]
    return (params["ent1"][heads],
            d_real * r1 - d_img * r2,
            params["ent1"][tails],
            params["ent2"][heads],
            d_real * r2 + d_img * r1,
            params["ent2"][tails])


if __name__ == "__main__":
    # bs deliberately not a multiple of the tile size to exercise padding.
    n_ent, n_rel, d_model, bs = 32, 8, 128, 12
    key = jax.random.PRNGKey(0)
    pkey, hkey, rkey, tkey, dkey = jax.random.split(key, 5)

    params = make_params(n_ent, n_rel, d_model, pkey)
    heads = jax.random.randint(hkey, (bs,), 0, n_ent, dtype=jnp.int32)
    rels = jax.random.randint(rkey, (bs,), 0, n_rel, dtype=jnp.int32)
    tails = jax.random.randint(tkey, (bs,), 0, n_ent, dtype=jnp.int32)
    day = jax.random.randint(dkey, (bs,), 1, 31).astype(jnp.float32)

    outs = noname_forward(heads, rels, tails, day, params)
    outs = jax.block_until_ready(outs)

    refs = _reference(heads, rels, tails, day, params)
    for o, r in zip(outs, refs):
        np.testing.assert_allclose(np.asarray(o), np.asarray(r),
                                   rtol=1e-5, atol=1e-5)
    print("KERNEL_OK")
</pallas_src>

<mosaic_0001>
module attributes {stable_mosaic.version = 11 : i64} {
  func.func @_rel_rotate_kernel(%arg0: i32, %arg1: memref<16xi32, #tpu.memory_space<smem>>, %arg2: memref<1x128xf32, #tpu.memory_space<vmem>>, %arg3: memref<8x1xf32, #tpu.memory_space<vmem>>, %arg4: memref<8x128xf32, #tpu.memory_space<any>>, %arg5: memref<8x128xf32, #tpu.memory_space<any>>, %arg6: memref<8x128xf32, #tpu.memory_space<vmem>>, %arg7: memref<8x128xf32, #tpu.memory_space<vmem>>, %arg8: memref<8x128xf32, #tpu.memory_space<vmem>>, %arg9: memref<8x128xf32, #tpu.memory_space<vmem>>, %arg10: memref<2x8x!tpu.dma_semaphore, #tpu.memory_space<semaphore_mem>>) attributes {dimension_semantics = [#tpu.dimension_semantics<parallel>], iteration_bounds = array<i64: 2>, scalar_prefetch = 1 : i64, scratch_operands = 3 : i64, tpu.core_type = #tpu.core_type<tc>, window_params = [{pipeline_mode = #tpu.pipeline_mode<synchronous>, transform_indices = @transform_0, window_bounds = array<i64: 1, 128>}, {transform_indices = @transform_1, window_bounds = array<i64: 8, 1>}, {}, {}, {transform_indices = @transform_4, window_bounds = array<i64: 8, 128>}, {transform_indices = @transform_5, window_bounds = array<i64: 8, 128>}]} {
    %c8_i32 = arith.constant 8 : i32
    %0 = arith.muli %arg0, %c8_i32 : i32
    %c0_i32 = arith.constant 0 : i32
    %1 = arith.addi %0, %c0_i32 : i32
    %2 = arith.index_cast %1 : i32 to index
    %3 = memref.load %arg1[%2] : memref<16xi32, #tpu.memory_space<smem>>
    %c0_i32_0 = arith.constant 0 : i32
    %c0_i32_1 = arith.constant 0 : i32
    %c0_i32_2 = arith.constant 0 : i32
    %4 = tpu.memref_slice %arg4[%3, %c0_i32_2] : memref<8x128xf32, #tpu.memory_space<any>> -> memref<1x128xf32, #tpu.memory_space<any>>
    %c0_i32_3 = arith.constant 0 : i32
    %c0_i32_4 = arith.constant 0 : i32
    %5 = tpu.memref_slice %arg8[%c0_i32_3, %c0_i32_4] : memref<8x128xf32, #tpu.memory_space<vmem>> -> memref<1x128xf32, #tpu.memory_space<vmem>>
    %6 = tpu.memref_slice %arg10[%c0_i32_0, %c0_i32_1] : memref<2x8x!tpu.dma_semaphore, #tpu.memory_space<semaphore_mem>> -> memref<1x1x!tpu.dma_semaphore, #tpu.memory_space<semaphore_mem>>
    %7 = tpu.memref_squeeze %6 : memref<1x1x!tpu.dma_semaphore, #tpu.memory_space<semaphore_mem>> -> memref<!tpu.dma_semaphore, #tpu.memory_space<semaphore_mem>>
    tpu.enqueue_dma source(%4 : memref<1x128xf32, #tpu.memory_space<any>>) target(%5 : memref<1x128xf32, #tpu.memory_space<vmem>>) target_semaphore(%7 : memref<!tpu.dma_semaphore, #tpu.memory_space<semaphore_mem>>)
    %c1_i32 = arith.constant 1 : i32
    %c0_i32_5 = arith.constant 0 : i32
    %c0_i32_6 = arith.constant 0 : i32
    %8 = tpu.memref_slice %arg5[%3, %c0_i32_6] : memref<8x128xf32, #tpu.memory_space<any>> -> memref<1x128xf32, #tpu.memory_space<any>>
    %c0_i32_7 = arith.constant 0 : i32
    %c0_i32_8 = arith.constant 0 : i32
    %9 = tpu.memref_slice %arg9[%c0_i32_7, %c0_i32_8] : memref<8x128xf32, #tpu.memory_space<vmem>> -> memref<1x128xf32, #tpu.memory_space<vmem>>
    %10 = tpu.memref_slice %arg10[%c1_i32, %c0_i32_5] : memref<2x8x!tpu.dma_semaphore, #tpu.memory_space<semaphore_mem>> -> memref<1x1x!tpu.dma_semaphore, #tpu.memory_space<semaphore_mem>>
    %11 = tpu.memref_squeeze %10 : memref<1x1x!tpu.dma_semaphore, #tpu.memory_space<semaphore_mem>> -> memref<!tpu.dma_semaphore, #tpu.memory_space<semaphore_mem>>
    tpu.enqueue_dma source(%8 : memref<1x128xf32, #tpu.memory_space<any>>) target(%9 : memref<1x128xf32, #tpu.memory_space<vmem>>) target_semaphore(%11 : memref<!tpu.dma_semaphore, #tpu.memory_space<semaphore_mem>>)
    %c1_i32_9 = arith.constant 1 : i32
    %12 = arith.addi %0, %c1_i32_9 : i32
    %13 = arith.index_cast %12 : i32 to index
    %14 = memref.load %arg1[%13] : memref<16xi32, #tpu.memory_space<smem>>
    %c0_i32_10 = arith.constant 0 : i32
    %c1_i32_11 = arith.constant 1 : i32
    %c0_i32_12 = arith.constant 0 : i32
    %15 = tpu.memref_slice %arg4[%14, %c0_i32_12] : memref<8x128xf32, #tpu.memory_space<any>> -> memref<1x128xf32, #tpu.memory_space<any>>
    %c1_i32_13 = arith.constant 1 : i32
    %c0_i32_14 = arith.constant 0 : i32
    %16 = tpu.memref_slice %arg8[%c1_i32_13, %c0_i32_14] : memref<8x128xf32, #tpu.memory_space<vmem>> -> memref<1x128xf32, #tpu.memory_space<vmem>>
    %17 = tpu.memref_slice %arg10[%c0_i32_10, %c1_i32_11] : memref<2x8x!tpu.dma_semaphore, #tpu.memory_space<semaphore_mem>> -> memref<1x1x!tpu.dma_semaphore, #tpu.memory_space<semaphore_mem>>
    %18 = tpu.memref_squeeze %17 : memref<1x1x!tpu.dma_semaphore, #tpu.memory_space<semaphore_mem>> -> memref<!tpu.dma_semaphore, #tpu.memory_space<semaphore_mem>>
    tpu.enqueue_dma source(%15 : memref<1x128xf32, #tpu.memory_space<any>>) target(%16 : memref<1x128xf32, #tpu.memory_space<vmem>>) target_semaphore(%18 : memref<!tpu.dma_semaphore, #tpu.memory_space<semaphore_mem>>)
    %c1_i32_15 = arith.constant 1 : i32
    %c1_i32_16 = arith.constant 1 : i32
    %c0_i32_17 = arith.constant 0 : i32
    %19 = tpu.memref_slice %arg5[%14, %c0_i32_17] : memref<8x128xf32, #tpu.memory_space<any>> -> memref<1x128xf32, #tpu.memory_space<any>>
    %c1_i32_18 = arith.constant 1 : i32
    %c0_i32_19 = arith.constant 0 : i32
    %20 = tpu.memref_slice %arg9[%c1_i32_18, %c0_i32_19] : memref<8x128xf32, #tpu.memory_space<vmem>> -> memref<1x128xf32, #tpu.memory_space<vmem>>
    %21 = tpu.memref_slice %arg10[%c1_i32_15, %c1_i32_16] : memref<2x8x!tpu.dma_semaphore, #tpu.memory_space<semaphore_mem>> -> memref<1x1x!tpu.dma_semaphore, #tpu.memory_space<semaphore_mem>>
    %22 = tpu.memref_squeeze %21 : memref<1x1x!tpu.dma_semaphore, #tpu.memory_space<semaphore_mem>> -> memref<!tpu.dma_semaphore, #tpu.memory_space<semaphore_mem>>
    tpu.enqueue_dma source(%19 : memref<1x128xf32, #tpu.memory_space<any>>) target(%20 : memref<1x128xf32, #tpu.memory_space<vmem>>) target_semaphore(%22 : memref<!tpu.dma_semaphore, #tpu.memory_space<semaphore_mem>>)
    %c2_i32 = arith.constant 2 : i32
    %23 = arith.addi %0, %c2_i32 : i32
    %24 = arith.index_cast %23 : i32 to index
    %25 = memref.load %arg1[%24] : memref<16xi32, #tpu.memory_space<smem>>
    %c0_i32_20 = arith.constant 0 : i32
    %c2_i32_21 = arith.constant 2 : i32
    %c0_i32_22 = arith.constant 0 : i32
    %26 = tpu.memref_slice %arg4[%25, %c0_i32_22] : memref<8x128xf32, #tpu.memory_space<any>> -> memref<1x128xf32, #tpu.memory_space<any>>
    %c2_i32_23 = arith.constant 2 : i32
    %c0_i32_24 = arith.constant 0 : i32
    %27 = tpu.memref_slice %arg8[%c2_i32_23, %c0_i32_24] : memref<8x128xf32, #tpu.memory_space<vmem>> -> memref<1x128xf32, #tpu.memory_space<vmem>>
    %28 = tpu.memref_slice %arg10[%c0_i32_20, %c2_i32_21] : memref<2x8x!tpu.dma_semaphore, #tpu.memory_space<semaphore_mem>> -> memref<1x1x!tpu.dma_semaphore, #tpu.memory_space<semaphore_mem>>
    %29 = tpu.memref_squeeze %28 : memref<1x1x!tpu.dma_semaphore, #tpu.memory_space<semaphore_mem>> -> memref<!tpu.dma_semaphore, #tpu.memory_space<semaphore_mem>>
    tpu.enqueue_dma source(%26 : memref<1x128xf32, #tpu.memory_space<any>>) target(%27 : memref<1x128xf32, #tpu.memory_space<vmem>>) target_semaphore(%29 : memref<!tpu.dma_semaphore, #tpu.memory_space<semaphore_mem>>)
    %c1_i32_25 = arith.constant 1 : i32
    %c2_i32_26 = arith.constant 2 : i32
    %c0_i32_27 = arith.constant 0 : i32
    %30 = tpu.memref_slice %arg5[%25, %c0_i32_27] : memref<8x128xf32, #tpu.memory_space<any>> -> memref<1x128xf32, #tpu.memory_space<any>>
    %c2_i32_28 = arith.constant 2 : i32
    %c0_i32_29 = arith.constant 0 : i32
    %31 = tpu.memref_slice %arg9[%c2_i32_28, %c0_i32_29] : memref<8x128xf32, #tpu.memory_space<vmem>> -> memref<1x128xf32, #tpu.memory_space<vmem>>
    %32 = tpu.memref_slice %arg10[%c1_i32_25, %c2_i32_26] : memref<2x8x!tpu.dma_semaphore, #tpu.memory_space<semaphore_mem>> -> memref<1x1x!tpu.dma_semaphore, #tpu.memory_space<semaphore_mem>>
    %33 = tpu.memref_squeeze %32 : memref<1x1x!tpu.dma_semaphore, #tpu.memory_space<semaphore_mem>> -> memref<!tpu.dma_semaphore, #tpu.memory_space<semaphore_mem>>
    tpu.enqueue_dma source(%30 : memref<1x128xf32, #tpu.memory_space<any>>) target(%31 : memref<1x128xf32, #tpu.memory_space<vmem>>) target_semaphore(%33 : memref<!tpu.dma_semaphore, #tpu.memory_space<semaphore_mem>>)
    %c3_i32 = arith.constant 3 : i32
    %34 = arith.addi %0, %c3_i32 : i32
    %35 = arith.index_cast %34 : i32 to index
    %36 = memref.load %arg1[%35] : memref<16xi32, #tpu.memory_space<smem>>
    %c0_i32_30 = arith.constant 0 : i32
    %c3_i32_31 = arith.constant 3 : i32
    %c0_i32_32 = arith.constant 0 : i32
    %37 = tpu.memref_slice %arg4[%36, %c0_i32_32] : memref<8x128xf32, #tpu.memory_space<any>> -> memref<1x128xf32, #tpu.memory_space<any>>
    %c3_i32_33 = arith.constant 3 : i32
    %c0_i32_34 = arith.constant 0 : i32
    %38 = tpu.memref_slice %arg8[%c3_i32_33, %c0_i32_34] : memref<8x128xf32, #tpu.memory_space<vmem>> -> memref<1x128xf32, #tpu.memory_space<vmem>>
    %39 = tpu.memref_slice %arg10[%c0_i32_30, %c3_i32_31] : memref<2x8x!tpu.dma_semaphore, #tpu.memory_space<semaphore_mem>> -> memref<1x1x!tpu.dma_semaphore, #tpu.memory_space<semaphore_mem>>
    %40 = tpu.memref_squeeze %39 : memref<1x1x!tpu.dma_semaphore, #tpu.memory_space<semaphore_mem>> -> memref<!tpu.dma_semaphore, #tpu.memory_space<semaphore_mem>>
    tpu.enqueue_dma source(%37 : memref<1x128xf32, #tpu.memory_space<any>>) target(%38 : memref<1x128xf32, #tpu.memory_space<vmem>>) target_semaphore(%40 : memref<!tpu.dma_semaphore, #tpu.memory_space<semaphore_mem>>)
    %c1_i32_35 = arith.constant 1 : i32
    %c3_i32_36 = arith.constant 3 : i32
    %c0_i32_37 = arith.constant 0 : i32
    %41 = tpu.memref_slice %arg5[%36, %c0_i32_37] : memref<8x128xf32, #tpu.memory_space<any>> -> memref<1x128xf32, #tpu.memory_space<any>>
    %c3_i32_38 = arith.constant 3 : i32
    %c0_i32_39 = arith.constant 0 : i32
    %42 = tpu.memref_slice %arg9[%c3_i32_38, %c0_i32_39] : memref<8x128xf32, #tpu.memory_space<vmem>> -> memref<1x128xf32, #tpu.memory_space<vmem>>
    %43 = tpu.memref_slice %arg10[%c1_i32_35, %c3_i32_36] : memref<2x8x!tpu.dma_semaphore, #tpu.memory_space<semaphore_mem>> -> memref<1x1x!tpu.dma_semaphore, #tpu.memory_space<semaphore_mem>>
    %44 = tpu.memref_squeeze %43 : memref<1x1x!tpu.dma_semaphore, #tpu.memory_space<semaphore_mem>> -> memref<!tpu.dma_semaphore, #tpu.memory_space<semaphore_mem>>
    tpu.enqueue_dma source(%41 : memref<1x128xf32, #tpu.memory_space<any>>) target(%42 : memref<1x128xf32, #tpu.memory_space<vmem>>) target_semaphore(%44 : memref<!tpu.dma_semaphore, #tpu.memory_space<semaphore_mem>>)
    %c4_i32 = arith.constant 4 : i32
    %45 = arith.addi %0, %c4_i32 : i32
    %46 = arith.index_cast %45 : i32 to index
    %47 = memref.load %arg1[%46] : memref<16xi32, #tpu.memory_space<smem>>
    %c0_i32_40 = arith.constant 0 : i32
    %c4_i32_41 = arith.constant 4 : i32
    %c0_i32_42 = arith.constant 0 : i32
    %48 = tpu.memref_slice %arg4[%47, %c0_i32_42] : memref<8x128xf32, #tpu.memory_space<any>> -> memref<1x128xf32, #tpu.memory_space<any>>
    %c4_i32_43 = arith.constant 4 : i32
    %c0_i32_44 = arith.constant 0 : i32
    %49 = tpu.memref_slice %arg8[%c4_i32_43, %c0_i32_44] : memref<8x128xf32, #tpu.memory_space<vmem>> -> memref<1x128xf32, #tpu.memory_space<vmem>>
    %50 = tpu.memref_slice %arg10[%c0_i32_40, %c4_i32_41] : memref<2x8x!tpu.dma_semaphore, #tpu.memory_space<semaphore_mem>> -> memref<1x1x!tpu.dma_semaphore, #tpu.memory_space<semaphore_mem>>
    %51 = tpu.memref_squeeze %50 : memref<1x1x!tpu.dma_semaphore, #tpu.memory_space<semaphore_mem>> -> memref<!tpu.dma_semaphore, #tpu.memory_space<semaphore_mem>>
    tpu.enqueue_dma source(%48 : memref<1x128xf32, #tpu.memory_space<any>>) target(%49 : memref<1x128xf32, #tpu.memory_space<vmem>>) target_semaphore(%51 : memref<!tpu.dma_semaphore, #tpu.memory_space<semaphore_mem>>)
    %c1_i32_45 = arith.constant 1 : i32
    %c4_i32_46 = arith.constant 4 : i32
    %c0_i32_47 = arith.constant 0 : i32
    %52 = tpu.memref_slice %arg5[%47, %c0_i32_47] : memref<8x128xf32, #tpu.memory_space<any>> -> memref<1x128xf32, #tpu.memory_space<any>>
    %c4_i32_48 = arith.constant 4 : i32
    %c0_i32_49 = arith.constant 0 : i32
    %53 = tpu.memref_slice %arg9[%c4_i32_48, %c0_i32_49] : memref<8x128xf32, #tpu.memory_space<vmem>> -> memref<1x128xf32, #tpu.memory_space<vmem>>
    %54 = tpu.memref_slice %arg10[%c1_i32_45, %c4_i32_46] : memref<2x8x!tpu.dma_semaphore, #tpu.memory_space<semaphore_mem>> -> memref<1x1x!tpu.dma_semaphore, #tpu.memory_space<semaphore_mem>>
    %55 = tpu.memref_squeeze %54 : memref<1x1x!tpu.dma_semaphore, #tpu.memory_space<semaphore_mem>> -> memref<!tpu.dma_semaphore, #tpu.memory_space<semaphore_mem>>
    tpu.enqueue_dma source(%52 : memref<1x128xf32, #tpu.memory_space<any>>) target(%53 : memref<1x128xf32, #tpu.memory_space<vmem>>) target_semaphore(%55 : memref<!tpu.dma_semaphore, #tpu.memory_space<semaphore_mem>>)
    %c5_i32 = arith.constant 5 : i32
    %56 = arith.addi %0, %c5_i32 : i32
    %57 = arith.index_cast %56 : i32 to index
    %58 = memref.load %arg1[%57] : memref<16xi32, #tpu.memory_space<smem>>
    %c0_i32_50 = arith.constant 0 : i32
    %c5_i32_51 = arith.constant 5 : i32
    %c0_i32_52 = arith.constant 0 : i32
    %59 = tpu.memref_slice %arg4[%58, %c0_i32_52] : memref<8x128xf32, #tpu.memory_space<any>> -> memref<1x128xf32, #tpu.memory_space<any>>
    %c5_i32_53 = arith.constant 5 : i32
    %c0_i32_54 = arith.constant 0 : i32
    %60 = tpu.memref_slice %arg8[%c5_i32_53, %c0_i32_54] : memref<8x128xf32, #tpu.memory_space<vmem>> -> memref<1x128xf32, #tpu.memory_space<vmem>>
    %61 = tpu.memref_slice %arg10[%c0_i32_50, %c5_i32_51] : memref<2x8x!tpu.dma_semaphore, #tpu.memory_space<semaphore_mem>> -> memref<1x1x!tpu.dma_semaphore, #tpu.memory_space<semaphore_mem>>
    %62 = tpu.memref_squeeze %61 : memref<1x1x!tpu.dma_semaphore, #tpu.memory_space<semaphore_mem>> -> memref<!tpu.dma_semaphore, #tpu.memory_space<semaphore_mem>>
    tpu.enqueue_dma source(%59 : memref<1x128xf32, #tpu.memory_space<any>>) target(%60 : memref<1x128xf32, #tpu.memory_space<vmem>>) target_semaphore(%62 : memref<!tpu.dma_semaphore, #tpu.memory_space<semaphore_mem>>)
    %c1_i32_55 = arith.constant 1 : i32
    %c5_i32_56 = arith.constant 5 : i32
    %c0_i32_57 = arith.constant 0 : i32
    %63 = tpu.memref_slice %arg5[%58, %c0_i32_57] : memref<8x128xf32, #tpu.memory_space<any>> -> memref<1x128xf32, #tpu.memory_space<any>>
    %c5_i32_58 = arith.constant 5 : i32
    %c0_i32_59 = arith.constant 0 : i32
    %64 = tpu.memref_slice %arg9[%c5_i32_58, %c0_i32_59] : memref<8x128xf32, #tpu.memory_space<vmem>> -> memref<1x128xf32, #tpu.memory_space<vmem>>
    %65 = tpu.memref_slice %arg10[%c1_i32_55, %c5_i32_56] : memref<2x8x!tpu.dma_semaphore, #tpu.memory_space<semaphore_mem>> -> memref<1x1x!tpu.dma_semaphore, #tpu.memory_space<semaphore_mem>>
    %66 = tpu.memref_squeeze %65 : memref<1x1x!tpu.dma_semaphore, #tpu.memory_space<semaphore_mem>> -> memref<!tpu.dma_semaphore, #tpu.memory_space<semaphore_mem>>
    tpu.enqueue_dma source(%63 : memref<1x128xf32, #tpu.memory_space<any>>) target(%64 : memref<1x128xf32, #tpu.memory_space<vmem>>) target_semaphore(%66 : memref<!tpu.dma_semaphore, #tpu.memory_space<semaphore_mem>>)
    %c6_i32 = arith.constant 6 : i32
    %67 = arith.addi %0, %c6_i32 : i32
    %68 = arith.index_cast %67 : i32 to index
    %69 = memref.load %arg1[%68] : memref<16xi32, #tpu.memory_space<smem>>
    %c0_i32_60 = arith.constant 0 : i32
    %c6_i32_61 = arith.constant 6 : i32
    %c0_i32_62 = arith.constant 0 : i32
    %70 = tpu.memref_slice %arg4[%69, %c0_i32_62] : memref<8x128xf32, #tpu.memory_space<any>> -> memref<1x128xf32, #tpu.memory_space<any>>
    %c6_i32_63 = arith.constant 6 : i32
    %c0_i32_64 = arith.constant 0 : i32
    %71 = tpu.memref_slice %arg8[%c6_i32_63, %c0_i32_64] : memref<8x128xf32, #tpu.memory_space<vmem>> -> memref<1x128xf32, #tpu.memory_space<vmem>>
    %72 = tpu.memref_slice %arg10[%c0_i32_60, %c6_i32_61] : memref<2x8x!tpu.dma_semaphore, #tpu.memory_space<semaphore_mem>> -> memref<1x1x!tpu.dma_semaphore, #tpu.memory_space<semaphore_mem>>
    %73 = tpu.memref_squeeze %72 : memref<1x1x!tpu.dma_semaphore, #tpu.memory_space<semaphore_mem>> -> memref<!tpu.dma_semaphore, #tpu.memory_space<semaphore_mem>>
    tpu.enqueue_dma source(%70 : memref<1x128xf32, #tpu.memory_space<any>>) target(%71 : memref<1x128xf32, #tpu.memory_space<vmem>>) target_semaphore(%73 : memref<!tpu.dma_semaphore, #tpu.memory_space<semaphore_mem>>)
    %c1_i32_65 = arith.constant 1 : i32
    %c6_i32_66 = arith.constant 6 : i32
    %c0_i32_67 = arith.constant 0 : i32
    %74 = tpu.memref_slice %arg5[%69, %c0_i32_67] : memref<8x128xf32, #tpu.memory_space<any>> -> memref<1x128xf32, #tpu.memory_space<any>>
    %c6_i32_68 = arith.constant 6 : i32
    %c0_i32_69 = arith.constant 0 : i32
    %75 = tpu.memref_slice %arg9[%c6_i32_68, %c0_i32_69] : memref<8x128xf32, #tpu.memory_space<vmem>> -> memref<1x128xf32, #tpu.memory_space<vmem>>
    %76 = tpu.memref_slice %arg10[%c1_i32_65, %c6_i32_66] : memref<2x8x!tpu.dma_semaphore, #tpu.memory_space<semaphore_mem>> -> memref<1x1x!tpu.dma_semaphore, #tpu.memory_space<semaphore_mem>>
    %77 = tpu.memref_squeeze %76 : memref<1x1x!tpu.dma_semaphore, #tpu.memory_space<semaphore_mem>> -> memref<!tpu.dma_semaphore, #tpu.memory_space<semaphore_mem>>
    tpu.enqueue_dma source(%74 : memref<1x128xf32, #tpu.memory_space<any>>) target(%75 : memref<1x128xf32, #tpu.memory_space<vmem>>) target_semaphore(%77 : memref<!tpu.dma_semaphore, #tpu.memory_space<semaphore_mem>>)
    %c7_i32 = arith.constant 7 : i32
    %78 = arith.addi %0, %c7_i32 : i32
    %79 = arith.index_cast %78 : i32 to index
    %80 = memref.load %arg1[%79] : memref<16xi32, #tpu.memory_space<smem>>
    %c0_i32_70 = arith.constant 0 : i32
    %c7_i32_71 = arith.constant 7 : i32
    %c0_i32_72 = arith.constant 0 : i32
    %81 = tpu.memref_slice %arg4[%80, %c0_i32_72] : memref<8x128xf32, #tpu.memory_space<any>> -> memref<1x128xf32, #tpu.memory_space<any>>
    %c7_i32_73 = arith.constant 7 : i32
    %c0_i32_74 = arith.constant 0 : i32
    %82 = tpu.memref_slice %arg8[%c7_i32_73, %c0_i32_74] : memref<8x128xf32, #tpu.memory_space<vmem>> -> memref<1x128xf32, #tpu.memory_space<vmem>>
    %83 = tpu.memref_slice %arg10[%c0_i32_70, %c7_i32_71] : memref<2x8x!tpu.dma_semaphore, #tpu.memory_space<semaphore_mem>> -> memref<1x1x!tpu.dma_semaphore, #tpu.memory_space<semaphore_mem>>
    %84 = tpu.memref_squeeze %83 : memref<1x1x!tpu.dma_semaphore, #tpu.memory_space<semaphore_mem>> -> memref<!tpu.dma_semaphore, #tpu.memory_space<semaphore_mem>>
    tpu.enqueue_dma source(%81 : memref<1x128xf32, #tpu.memory_space<any>>) target(%82 : memref<1x128xf32, #tpu.memory_space<vmem>>) target_semaphore(%84 : memref<!tpu.dma_semaphore, #tpu.memory_space<semaphore_mem>>)
    %c1_i32_75 = arith.constant 1 : i32
    %c7_i32_76 = arith.constant 7 : i32
    %c0_i32_77 = arith.constant 0 : i32
    %85 = tpu.memref_slice %arg5[%80, %c0_i32_77] : memref<8x128xf32, #tpu.memory_space<any>> -> memref<1x128xf32, #tpu.memory_space<any>>
    %c7_i32_78 = arith.constant 7 : i32
    %c0_i32_79 = arith.constant 0 : i32
    %86 = tpu.memref_slice %arg9[%c7_i32_78, %c0_i32_79] : memref<8x128xf32, #tpu.memory_space<vmem>> -> memref<1x128xf32, #tpu.memory_space<vmem>>
    %87 = tpu.memref_slice %arg10[%c1_i32_75, %c7_i32_76] : memref<2x8x!tpu.dma_semaphore, #tpu.memory_space<semaphore_mem>> -> memref<1x1x!tpu.dma_semaphore, #tpu.memory_space<semaphore_mem>>
    %88 = tpu.memref_squeeze %87 : memref<1x1x!tpu.dma_semaphore, #tpu.memory_space<semaphore_mem>> -> memref<!tpu.dma_semaphore, #tpu.memory_space<semaphore_mem>>
    tpu.enqueue_dma source(%85 : memref<1x128xf32, #tpu.memory_space<any>>) target(%86 : memref<1x128xf32, #tpu.memory_space<vmem>>) target_semaphore(%88 : memref<!tpu.dma_semaphore, #tpu.memory_space<semaphore_mem>>)
    %c0 = arith.constant 0 : index
    %c0_80 = arith.constant 0 : index
    %89 = vector.load %arg2[%c0, %c0_80] : memref<1x128xf32, #tpu.memory_space<vmem>>, vector<1x128xf32>
    %c0_81 = arith.constant 0 : index
    %c0_82 = arith.constant 0 : index
    %90 = vector.load %arg3[%c0_81, %c0_82] : memref<8x1xf32, #tpu.memory_space<vmem>>, vector<8x1xf32>
    %91 = vector.broadcast %89 : vector<1x128xf32> to vector<8x128xf32>
    %92 = vector.broadcast %90 : vector<8x1xf32> to vector<8x128xf32>
    %93 = arith.mulf %91, %92 : vector<8x128xf32>
    %94 = math.sin %93 : vector<8x128xf32>
    %95 = math.cos %93 : vector<8x128xf32>
    %c0_i32_83 = arith.constant 0 : i32
    %c0_i32_84 = arith.constant 0 : i32
    %c0_i32_85 = arith.constant 0 : i32
    %96 = tpu.memref_slice %arg4[%3, %c0_i32_85] : memref<8x128xf32, #tpu.memory_space<any>> -> memref<1x128xf32, #tpu.memory_space<any>>
    %c0_i32_86 = arith.constant 0 : i32
    %c0_i32_87 = arith.constant 0 : i32
    %97 = tpu.memref_slice %arg8[%c0_i32_86, %c0_i32_87] : memref<8x128xf32, #tpu.memory_space<vmem>> -> memref<1x128xf32, #tpu.memory_space<vmem>>
    %98 = tpu.memref_slice %arg10[%c0_i32_83, %c0_i32_84] : memref<2x8x!tpu.dma_semaphore, #tpu.memory_space<semaphore_mem>> -> memref<1x1x!tpu.dma_semaphore, #tpu.memory_space<semaphore_mem>>
    %99 = tpu.memref_squeeze %98 : memref<1x1x!tpu.dma_semaphore, #tpu.memory_space<semaphore_mem>> -> memref<!tpu.dma_semaphore, #tpu.memory_space<semaphore_mem>>
    tpu.wait_dma2 semaphore(%99 : memref<!tpu.dma_semaphore, #tpu.memory_space<semaphore_mem>>) src(%96 : memref<1x128xf32, #tpu.memory_space<any>>) dst(%97 : memref<1x128xf32, #tpu.memory_space<vmem>>)
    %c1_i32_88 = arith.constant 1 : i32
    %c0_i32_89 = arith.constant 0 : i32
    %c0_i32_90 = arith.constant 0 : i32
    %100 = tpu.memref_slice %arg5[%3, %c0_i32_90] : memref<8x128xf32, #tpu.memory_space<any>> -> memref<1x128xf32, #tpu.memory_space<any>>
    %c0_i32_91 = arith.constant 0 : i32
    %c0_i32_92 = arith.constant 0 : i32
    %101 = tpu.memref_slice %arg9[%c0_i32_91, %c0_i32_92] : memref<8x128xf32, #tpu.memory_space<vmem>> -> memref<1x128xf32, #tpu.memory_space<vmem>>
    %102 = tpu.memref_slice %arg10[%c1_i32_88, %c0_i32_89] : memref<2x8x!tpu.dma_semaphore, #tpu.memory_space<semaphore_mem>> -> memref<1x1x!tpu.dma_semaphore, #tpu.memory_space<semaphore_mem>>
    %103 = tpu.memref_squeeze %102 : memref<1x1x!tpu.dma_semaphore, #tpu.memory_space<semaphore_mem>> -> memref<!tpu.dma_semaphore, #tpu.memory_space<semaphore_mem>>
    tpu.wait_dma2 semaphore(%103 : memref<!tpu.dma_semaphore, #tpu.memory_space<semaphore_mem>>) src(%100 : memref<1x128xf32, #tpu.memory_space<any>>) dst(%101 : memref<1x128xf32, #tpu.memory_space<vmem>>)
    %c0_i32_93 = arith.constant 0 : i32
    %c1_i32_94 = arith.constant 1 : i32
    %c0_i32_95 = arith.constant 0 : i32
    %104 = tpu.memref_slice %arg4[%14, %c0_i32_95] : memref<8x128xf32, #tpu.memory_space<any>> -> memref<1x128xf32, #tpu.memory_space<any>>
    %c1_i32_96 = arith.constant 1 : i32
    %c0_i32_97 = arith.constant 0 : i32
    %105 = tpu.memref_slice %arg8[%c1_i32_96, %c0_i32_97] : memref<8x128xf32, #tpu.memory_space<vmem>> -> memref<1x128xf32, #tpu.memory_space<vmem>>
    %106 = tpu.memref_slice %arg10[%c0_i32_93, %c1_i32_94] : memref<2x8x!tpu.dma_semaphore, #tpu.memory_space<semaphore_mem>> -> memref<1x1x!tpu.dma_semaphore, #tpu.memory_space<semaphore_mem>>
    %107 = tpu.memref_squeeze %106 : memref<1x1x!tpu.dma_semaphore, #tpu.memory_space<semaphore_mem>> -> memref<!tpu.dma_semaphore, #tpu.memory_space<semaphore_mem>>
    tpu.wait_dma2 semaphore(%107 : memref<!tpu.dma_semaphore, #tpu.memory_space<semaphore_mem>>) src(%104 : memref<1x128xf32, #tpu.memory_space<any>>) dst(%105 : memref<1x128xf32, #tpu.memory_space<vmem>>)
    %c1_i32_98 = arith.constant 1 : i32
    %c1_i32_99 = arith.constant 1 : i32
    %c0_i32_100 = arith.constant 0 : i32
    %108 = tpu.memref_slice %arg5[%14, %c0_i32_100] : memref<8x128xf32, #tpu.memory_space<any>> -> memref<1x128xf32, #tpu.memory_space<any>>
    %c1_i32_101 = arith.constant 1 : i32
    %c0_i32_102 = arith.constant 0 : i32
    %109 = tpu.memref_slice %arg9[%c1_i32_101, %c0_i32_102] : memref<8x128xf32, #tpu.memory_space<vmem>> -> memref<1x128xf32, #tpu.memory_space<vmem>>
    %110 = tpu.memref_slice %arg10[%c1_i32_98, %c1_i32_99] : memref<2x8x!tpu.dma_semaphore, #tpu.memory_space<semaphore_mem>> -> memref<1x1x!tpu.dma_semaphore, #tpu.memory_space<semaphore_mem>>
    %111 = tpu.memref_squeeze %110 : memref<1x1x!tpu.dma_semaphore, #tpu.memory_space<semaphore_mem>> -> memref<!tpu.dma_semaphore, #tpu.memory_space<semaphore_mem>>
    tpu.wait_dma2 semaphore(%111 : memref<!tpu.dma_semaphore, #tpu.memory_space<semaphore_mem>>) src(%108 : memref<1x128xf32, #tpu.memory_space<any>>) dst(%109 : memref<1x128xf32, #tpu.memory_space<vmem>>)
    %c0_i32_103 = arith.constant 0 : i32
    %c2_i32_104 = arith.constant 2 : i32
    %c0_i32_105 = arith.constant 0 : i32
    %112 = tpu.memref_slice %arg4[%25, %c0_i32_105] : memref<8x128xf32, #tpu.memory_space<any>> -> memref<1x128xf32, #tpu.memory_space<any>>
    %c2_i32_106 = arith.constant 2 : i32
    %c0_i32_107 = arith.constant 0 : i32
    %113 = tpu.memref_slice %arg8[%c2_i32_106, %c0_i32_107] : memref<8x128xf32, #tpu.memory_space<vmem>> -> memref<1x128xf32, #tpu.memory_space<vmem>>
    %114 = tpu.memref_slice %arg10[%c0_i32_103, %c2_i32_104] : memref<2x8x!tpu.dma_semaphore, #tpu.memory_space<semaphore_mem>> -> memref<1x1x!tpu.dma_semaphore, #tpu.memory_space<semaphore_mem>>
    %115 = tpu.memref_squeeze %114 : memref<1x1x!tpu.dma_semaphore, #tpu.memory_space<semaphore_mem>> -> memref<!tpu.dma_semaphore, #tpu.memory_space<semaphore_mem>>
    tpu.wait_dma2 semaphore(%115 : memref<!tpu.dma_semaphore, #tpu.memory_space<semaphore_mem>>) src(%112 : memref<1x128xf32, #tpu.memory_space<any>>) dst(%113 : memref<1x128xf32, #tpu.memory_space<vmem>>)
    %c1_i32_108 = arith.constant 1 : i32
    %c2_i32_109 = arith.constant 2 : i32
    %c0_i32_110 = arith.constant 0 : i32
    %116 = tpu.memref_slice %arg5[%25, %c0_i32_110] : memref<8x128xf32, #tpu.memory_space<any>> -> memref<1x128xf32, #tpu.memory_space<any>>
    %c2_i32_111 = arith.constant 2 : i32
    %c0_i32_112 = arith.constant 0 : i32
    %117 = tpu.memref_slice %arg9[%c2_i32_111, %c0_i32_112] : memref<8x128xf32, #tpu.memory_space<vmem>> -> memref<1x128xf32, #tpu.memory_space<vmem>>
    %118 = tpu.memref_slice %arg10[%c1_i32_108, %c2_i32_109] : memref<2x8x!tpu.dma_semaphore, #tpu.memory_space<semaphore_mem>> -> memref<1x1x!tpu.dma_semaphore, #tpu.memory_space<semaphore_mem>>
    %119 = tpu.memref_squeeze %118 : memref<1x1x!tpu.dma_semaphore, #tpu.memory_space<semaphore_mem>> -> memref<!tpu.dma_semaphore, #tpu.memory_space<semaphore_mem>>
    tpu.wait_dma2 semaphore(%119 : memref<!tpu.dma_semaphore, #tpu.memory_space<semaphore_mem>>) src(%116 : memref<1x128xf32, #tpu.memory_space<any>>) dst(%117 : memref<1x128xf32, #tpu.memory_space<vmem>>)
    %c0_i32_113 = arith.constant 0 : i32
    %c3_i32_114 = arith.constant 3 : i32
    %c0_i32_115 = arith.constant 0 : i32
    %120 = tpu.memref_slice %arg4[%36, %c0_i32_115] : memref<8x128xf32, #tpu.memory_space<any>> -> memref<1x128xf32, #tpu.memory_space<any>>
    %c3_i32_116 = arith.constant 3 : i32
    %c0_i32_117 = arith.constant 0 : i32
    %121 = tpu.memref_slice %arg8[%c3_i32_116, %c0_i32_117] : memref<8x128xf32, #tpu.memory_space<vmem>> -> memref<1x128xf32, #tpu.memory_space<vmem>>
    %122 = tpu.memref_slice %arg10[%c0_i32_113, %c3_i32_114] : memref<2x8x!tpu.dma_semaphore, #tpu.memory_space<semaphore_mem>> -> memref<1x1x!tpu.dma_semaphore, #tpu.memory_space<semaphore_mem>>
    %123 = tpu.memref_squeeze %122 : memref<1x1x!tpu.dma_semaphore, #tpu.memory_space<semaphore_mem>> -> memref<!tpu.dma_semaphore, #tpu.memory_space<semaphore_mem>>
    tpu.wait_dma2 semaphore(%123 : memref<!tpu.dma_semaphore, #tpu.memory_space<semaphore_mem>>) src(%120 : memref<1x128xf32, #tpu.memory_space<any>>) dst(%121 : memref<1x128xf32, #tpu.memory_space<vmem>>)
    %c1_i32_118 = arith.constant 1 : i32
    %c3_i32_119 = arith.constant 3 : i32
    %c0_i32_120 = arith.constant 0 : i32
    %124 = tpu.memref_slice %arg5[%36, %c0_i32_120] : memref<8x128xf32, #tpu.memory_space<any>> -> memref<1x128xf32, #tpu.memory_space<any>>
    %c3_i32_121 = arith.constant 3 : i32
    %c0_i32_122 = arith.constant 0 : i32
    %125 = tpu.memref_slice %arg9[%c3_i32_121, %c0_i32_122] : memref<8x128xf32, #tpu.memory_space<vmem>> -> memref<1x128xf32, #tpu.memory_space<vmem>>
    %126 = tpu.memref_slice %arg10[%c1_i32_118, %c3_i32_119] : memref<2x8x!tpu.dma_semaphore, #tpu.memory_space<semaphore_mem>> -> memref<1x1x!tpu.dma_semaphore, #tpu.memory_space<semaphore_mem>>
    %127 = tpu.memref_squeeze %126 : memref<1x1x!tpu.dma_semaphore, #tpu.memory_space<semaphore_mem>> -> memref<!tpu.dma_semaphore, #tpu.memory_space<semaphore_mem>>
    tpu.wait_dma2 semaphore(%127 : memref<!tpu.dma_semaphore, #tpu.memory_space<semaphore_mem>>) src(%124 : memref<1x128xf32, #tpu.memory_space<any>>) dst(%125 : memref<1x128xf32, #tpu.memory_space<vmem>>)
    %c0_i32_123 = arith.constant 0 : i32
    %c4_i32_124 = arith.constant 4 : i32
    %c0_i32_125 = arith.constant 0 : i32
    %128 = tpu.memref_slice %arg4[%47, %c0_i32_125] : memref<8x128xf32, #tpu.memory_space<any>> -> memref<1x128xf32, #tpu.memory_space<any>>
    %c4_i32_126 = arith.constant 4 : i32
    %c0_i32_127 = arith.constant 0 : i32
    %129 = tpu.memref_slice %arg8[%c4_i32_126, %c0_i32_127] : memref<8x128xf32, #tpu.memory_space<vmem>> -> memref<1x128xf32, #tpu.memory_space<vmem>>
    %130 = tpu.memref_slice %arg10[%c0_i32_123, %c4_i32_124] : memref<2x8x!tpu.dma_semaphore, #tpu.memory_space<semaphore_mem>> -> memref<1x1x!tpu.dma_semaphore, #tpu.memory_space<semaphore_mem>>
    %131 = tpu.memref_squeeze %130 : memref<1x1x!tpu.dma_semaphore, #tpu.memory_space<semaphore_mem>> -> memref<!tpu.dma_semaphore, #tpu.memory_space<semaphore_mem>>
    tpu.wait_dma2 semaphore(%131 : memref<!tpu.dma_semaphore, #tpu.memory_space<semaphore_mem>>) src(%128 : memref<1x128xf32, #tpu.memory_space<any>>) dst(%129 : memref<1x128xf32, #tpu.memory_space<vmem>>)
    %c1_i32_128 = arith.constant 1 : i32
    %c4_i32_129 = arith.constant 4 : i32
    %c0_i32_130 = arith.constant 0 : i32
    %132 = tpu.memref_slice %arg5[%47, %c0_i32_130] : memref<8x128xf32, #tpu.memory_space<any>> -> memref<1x128xf32, #tpu.memory_space<any>>
    %c4_i32_131 = arith.constant 4 : i32
    %c0_i32_132 = arith.constant 0 : i32
    %133 = tpu.memref_slice %arg9[%c4_i32_131, %c0_i32_132] : memref<8x128xf32, #tpu.memory_space<vmem>> -> memref<1x128xf32, #tpu.memory_space<vmem>>
    %134 = tpu.memref_slice %arg10[%c1_i32_128, %c4_i32_129] : memref<2x8x!tpu.dma_semaphore, #tpu.memory_space<semaphore_mem>> -> memref<1x1x!tpu.dma_semaphore, #tpu.memory_space<semaphore_mem>>
    %135 = tpu.memref_squeeze %134 : memref<1x1x!tpu.dma_semaphore, #tpu.memory_space<semaphore_mem>> -> memref<!tpu.dma_semaphore, #tpu.memory_space<semaphore_mem>>
    tpu.wait_dma2 semaphore(%135 : memref<!tpu.dma_semaphore, #tpu.memory_space<semaphore_mem>>) src(%132 : memref<1x128xf32, #tpu.memory_space<any>>) dst(%133 : memref<1x128xf32, #tpu.memory_space<vmem>>)
    %c0_i32_133 = arith.constant 0 : i32
    %c5_i32_134 = arith.constant 5 : i32
    %c0_i32_135 = arith.constant 0 : i32
    %136 = tpu.memref_slice %arg4[%58, %c0_i32_135] : memref<8x128xf32, #tpu.memory_space<any>> -> memref<1x128xf32, #tpu.memory_space<any>>
    %c5_i32_136 = arith.constant 5 : i32
    %c0_i32_137 = arith.constant 0 : i32
    %137 = tpu.memref_slice %arg8[%c5_i32_136, %c0_i32_137] : memref<8x128xf32, #tpu.memory_space<vmem>> -> memref<1x128xf32, #tpu.memory_space<vmem>>
    %138 = tpu.memref_slice %arg10[%c0_i32_133, %c5_i32_134] : memref<2x8x!tpu.dma_semaphore, #tpu.memory_space<semaphore_mem>> -> memref<1x1x!tpu.dma_semaphore, #tpu.memory_space<semaphore_mem>>
    %139 = tpu.memref_squeeze %138 : memref<1x1x!tpu.dma_semaphore, #tpu.memory_space<semaphore_mem>> -> memref<!tpu.dma_semaphore, #tpu.memory_space<semaphore_mem>>
    tpu.wait_dma2 semaphore(%139 : memref<!tpu.dma_semaphore, #tpu.memory_space<semaphore_mem>>) src(%136 : memref<1x128xf32, #tpu.memory_space<any>>) dst(%137 : memref<1x128xf32, #tpu.memory_space<vmem>>)
    %c1_i32_138 = arith.constant 1 : i32
    %c5_i32_139 = arith.constant 5 : i32
    %c0_i32_140 = arith.constant 0 : i32
    %140 = tpu.memref_slice %arg5[%58, %c0_i32_140] : memref<8x128xf32, #tpu.memory_space<any>> -> memref<1x128xf32, #tpu.memory_space<any>>
    %c5_i32_141 = arith.constant 5 : i32
    %c0_i32_142 = arith.constant 0 : i32
    %141 = tpu.memref_slice %arg9[%c5_i32_141, %c0_i32_142] : memref<8x128xf32, #tpu.memory_space<vmem>> -> memref<1x128xf32, #tpu.memory_space<vmem>>
    %142 = tpu.memref_slice %arg10[%c1_i32_138, %c5_i32_139] : memref<2x8x!tpu.dma_semaphore, #tpu.memory_space<semaphore_mem>> -> memref<1x1x!tpu.dma_semaphore, #tpu.memory_space<semaphore_mem>>
    %143 = tpu.memref_squeeze %142 : memref<1x1x!tpu.dma_semaphore, #tpu.memory_space<semaphore_mem>> -> memref<!tpu.dma_semaphore, #tpu.memory_space<semaphore_mem>>
    tpu.wait_dma2 semaphore(%143 : memref<!tpu.dma_semaphore, #tpu.memory_space<semaphore_mem>>) src(%140 : memref<1x128xf32, #tpu.memory_space<any>>) dst(%141 : memref<1x128xf32, #tpu.memory_space<vmem>>)
    %c0_i32_143 = arith.constant 0 : i32
    %c6_i32_144 = arith.constant 6 : i32
    %c0_i32_145 = arith.constant 0 : i32
    %144 = tpu.memref_slice %arg4[%69, %c0_i32_145] : memref<8x128xf32, #tpu.memory_space<any>> -> memref<1x128xf32, #tpu.memory_space<any>>
    %c6_i32_146 = arith.constant 6 : i32
    %c0_i32_147 = arith.constant 0 : i32
    %145 = tpu.memref_slice %arg8[%c6_i32_146, %c0_i32_147] : memref<8x128xf32, #tpu.memory_space<vmem>> -> memref<1x128xf32, #tpu.memory_space<vmem>>
    %146 = tpu.memref_slice %arg10[%c0_i32_143, %c6_i32_144] : memref<2x8x!tpu.dma_semaphore, #tpu.memory_space<semaphore_mem>> -> memref<1x1x!tpu.dma_semaphore, #tpu.memory_space<semaphore_mem>>
    %147 = tpu.memref_squeeze %146 : memref<1x1x!tpu.dma_semaphore, #tpu.memory_space<semaphore_mem>> -> memref<!tpu.dma_semaphore, #tpu.memory_space<semaphore_mem>>
    tpu.wait_dma2 semaphore(%147 : memref<!tpu.dma_semaphore, #tpu.memory_space<semaphore_mem>>) src(%144 : memref<1x128xf32, #tpu.memory_space<any>>) dst(%145 : memref<1x128xf32, #tpu.memory_space<vmem>>)
    %c1_i32_148 = arith.constant 1 : i32
    %c6_i32_149 = arith.constant 6 : i32
    %c0_i32_150 = arith.constant 0 : i32
    %148 = tpu.memref_slice %arg5[%69, %c0_i32_150] : memref<8x128xf32, #tpu.memory_space<any>> -> memref<1x128xf32, #tpu.memory_space<any>>
    %c6_i32_151 = arith.constant 6 : i32
    %c0_i32_152 = arith.constant 0 : i32
    %149 = tpu.memref_slice %arg9[%c6_i32_151, %c0_i32_152] : memref<8x128xf32, #tpu.memory_space<vmem>> -> memref<1x128xf32, #tpu.memory_space<vmem>>
    %150 = tpu.memref_slice %arg10[%c1_i32_148, %c6_i32_149] : memref<2x8x!tpu.dma_semaphore, #tpu.memory_space<semaphore_mem>> -> memref<1x1x!tpu.dma_semaphore, #tpu.memory_space<semaphore_mem>>
    %151 = tpu.memref_squeeze %150 : memref<1x1x!tpu.dma_semaphore, #tpu.memory_space<semaphore_mem>> -> memref<!tpu.dma_semaphore, #tpu.memory_space<semaphore_mem>>
    tpu.wait_dma2 semaphore(%151 : memref<!tpu.dma_semaphore, #tpu.memory_space<semaphore_mem>>) src(%148 : memref<1x128xf32, #tpu.memory_space<any>>) dst(%149 : memref<1x128xf32, #tpu.memory_space<vmem>>)
    %c0_i32_153 = arith.constant 0 : i32
    %c7_i32_154 = arith.constant 7 : i32
    %c0_i32_155 = arith.constant 0 : i32
    %152 = tpu.memref_slice %arg4[%80, %c0_i32_155] : memref<8x128xf32, #tpu.memory_space<any>> -> memref<1x128xf32, #tpu.memory_space<any>>
    %c7_i32_156 = arith.constant 7 : i32
    %c0_i32_157 = arith.constant 0 : i32
    %153 = tpu.memref_slice %arg8[%c7_i32_156, %c0_i32_157] : memref<8x128xf32, #tpu.memory_space<vmem>> -> memref<1x128xf32, #tpu.memory_space<vmem>>
    %154 = tpu.memref_slice %arg10[%c0_i32_153, %c7_i32_154] : memref<2x8x!tpu.dma_semaphore, #tpu.memory_space<semaphore_mem>> -> memref<1x1x!tpu.dma_semaphore, #tpu.memory_space<semaphore_mem>>
    %155 = tpu.memref_squeeze %154 : memref<1x1x!tpu.dma_semaphore, #tpu.memory_space<semaphore_mem>> -> memref<!tpu.dma_semaphore, #tpu.memory_space<semaphore_mem>>
    tpu.wait_dma2 semaphore(%155 : memref<!tpu.dma_semaphore, #tpu.memory_space<semaphore_mem>>) src(%152 : memref<1x128xf32, #tpu.memory_space<any>>) dst(%153 : memref<1x128xf32, #tpu.memory_space<vmem>>)
    %c1_i32_158 = arith.constant 1 : i32
    %c7_i32_159 = arith.constant 7 : i32
    %c0_i32_160 = arith.constant 0 : i32
    %156 = tpu.memref_slice %arg5[%80, %c0_i32_160] : memref<8x128xf32, #tpu.memory_space<any>> -> memref<1x128xf32, #tpu.memory_space<any>>
    %c7_i32_161 = arith.constant 7 : i32
    %c0_i32_162 = arith.constant 0 : i32
    %157 = tpu.memref_slice %arg9[%c7_i32_161, %c0_i32_162] : memref<8x128xf32, #tpu.memory_space<vmem>> -> memref<1x128xf32, #tpu.memory_space<vmem>>
    %158 = tpu.memref_slice %arg10[%c1_i32_158, %c7_i32_159] : memref<2x8x!tpu.dma_semaphore, #tpu.memory_space<semaphore_mem>> -> memref<1x1x!tpu.dma_semaphore, #tpu.memory_space<semaphore_mem>>
    %159 = tpu.memref_squeeze %158 : memref<1x1x!tpu.dma_semaphore, #tpu.memory_space<semaphore_mem>> -> memref<!tpu.dma_semaphore, #tpu.memory_space<semaphore_mem>>
    tpu.wait_dma2 semaphore(%159 : memref<!tpu.dma_semaphore, #tpu.memory_space<semaphore_mem>>) src(%156 : memref<1x128xf32, #tpu.memory_space<any>>) dst(%157 : memref<1x128xf32, #tpu.memory_space<vmem>>)
    %c0_163 = arith.constant 0 : index
    %c0_164 = arith.constant 0 : index
    %160 = vector.load %arg8[%c0_163, %c0_164] : memref<8x128xf32, #tpu.memory_space<vmem>>, vector<8x128xf32>
    %c0_165 = arith.constant 0 : index
    %c0_166 = arith.constant 0 : index
    %161 = vector.load %arg9[%c0_165, %c0_166] : memref<8x128xf32, #tpu.memory_space<vmem>>, vector<8x128xf32>
    %162 = arith.mulf %95, %160 : vector<8x128xf32>
    %163 = arith.mulf %94, %161 : vector<8x128xf32>
    %164 = arith.subf %162, %163 : vector<8x128xf32>
    %c0_167 = arith.constant 0 : index
    %c0_168 = arith.constant 0 : index
    %165 = vector.load %arg6[%c0_167, %c0_168] : memref<8x128xf32, #tpu.memory_space<vmem>>, vector<8x128xf32>
    tpu.vector_store %arg6[%c0_167, %c0_168], %164 {strides = array<i32>} : memref<8x128xf32, #tpu.memory_space<vmem>>, vector<8x128xf32>,
    %166 = arith.mulf %95, %161 : vector<8x128xf32>
    %167 = arith.mulf %94, %160 : vector<8x128xf32>
    %168 = arith.addf %166, %167 : vector<8x128xf32>
    %c0_169 = arith.constant 0 : index
    %c0_170 = arith.constant 0 : index
    %169 = vector.load %arg7[%c0_169, %c0_170] : memref<8x128xf32, #tpu.memory_space<vmem>>, vector<8x128xf32>
    tpu.vector_store %arg7[%c0_169, %c0_170], %168 {strides = array<i32>} : memref<8x128xf32, #tpu.memory_space<vmem>>, vector<8x128xf32>,
    return
  }
  func.func @transform_0(%arg0: i32, %arg1: memref<16xi32, #tpu.memory_space<smem>>) -> (i32, i32) {
    %c0_i32 = arith.constant 0 : i32
    %c0_i32_0 = arith.constant 0 : i32
    %c0_i32_1 = arith.constant 0 : i32
    return %c0_i32, %c0_i32_0 : i32, i32
  }
  func.func @transform_1(%arg0: i32, %arg1: memref<16xi32, #tpu.memory_space<smem>>) -> (i32, i32) {
    %c0_i32 = arith.constant 0 : i32
    %c0_i32_0 = arith.constant 0 : i32
    return %arg0, %c0_i32 : i32, i32
  }
  func.func @transform_4(%arg0: i32, %arg1: memref<16xi32, #tpu.memory_space<smem>>) -> (i32, i32) {
    %c0_i32 = arith.constant 0 : i32
    %c0_i32_0 = arith.constant 0 : i32
    return %arg0, %c0_i32 : i32, i32
  }
  func.func @transform_5(%arg0: i32, %arg1: memref<16xi32, #tpu.memory_space<smem>>) -> (i32, i32) {
    %c0_i32 = arith.constant 0 : i32
    %c0_i32_0 = arith.constant 0 : i32
    return %arg0, %c0_i32 : i32, i32
  }
}

</mosaic_0001>

<bundles_post_ra>
// kernel: tpu_custom_call.1
= control target key start
LH: loop header
LB: loop body
LE: loop exit
PB: predicated region body
PF: predicated region fallthrough
CT: control target
= control target key end

     0   :  { %s1780_s24 = smov [#allocation6]   ;;  %s2079_s0 = inlined_call_operand.vmem [shape: s32[16], index: 0, kind: input, shape index: {}]   ;;  %s2080_s1 = inlined_call_operand.hbm [shape: f32[1,128], index: 1, kind: input, shape index: {}]   ;;  %s2081_s2 = inlined_call_operand.vmem [shape: f32[16,1], index: 2, kind: input, shape index: {}]   ;;  %s2082_s3 = inlined_call_operand.vmem [shape: f32[8,128], index: 3, kind: input, shape index: {}]   ;;  %s2083_s4 = inlined_call_operand.vmem [shape: f32[8,128], index: 4, kind: input, shape index: {}]   ;;  %s2084_s5 = inlined_call_operand.hbm [shape: f32[16,128], index: 5, kind: output, shape index: {0}]   ;;  %s2085_s6 = inlined_call_operand.hbm [shape: f32[16,128], index: 6, kind: output, shape index: {1}]  }
   0x1   :  { %s13_s23 = sshll.u32 %s2079_s0, 4  ;;  %s14_s23 = int_to_ptr.vmem [resolvable:$true] %s13_s23 }
   0x2   :  { %16 = dma.vmem_to_smem %s14_s23, 16, %s1780_s24, [#allocation5] }
   0x3   :  { %1718 = dma.done.wait [#allocation5], 16 }
   0x4   :  { %1719 = vsyncadd [#allocation5], 4294967280 }
   0x5   :  { %19 = sfence }
   0x6   :  { %20 = vsyncpa [#allocation8], 0 }
   0x7   :  { %21 = vsyncpa [#allocation9], 0 }
   0x8   :  { %23 = vsyncpa [#allocation9 + $0x1], 0 }
   0x9   :  { %24 = vsyncpa [#allocation12], 0 }
   0xa   :  { %26 = vsyncpa [#allocation12 + $0x1], 0  ;;  %s1827_s25 = smov 0   ;;  %s1829_s26 = smov 0  }
   0xb   :  { %s1831_s27 = smov 0   ;;  %s1833_s28 = smov 0  }
   0xc LB: > { %s1848_s0 = sadd.s32 4294967295, %s1778_s28   ;;  %s1501_s29 = sadd.s32 4294967294, %s1778_s28   ;;  %s1778_s28 = sphi %s1833_s28, %s2091_s28   ;;  %s1774_s27 = sphi %s1831_s27, %s2090_s27   ;;  %s1770_s26 = sphi %s1829_s26, %s2089_s26   ;;  %s1766_s25 = sphi %s1827_s25, %s2088_s25  }
   0xd   : > { %s1852_s30 = sadd.s32 1, %s1778_s28   ;;  %s86_s7 = sadd.s32 1, %s1774_s27 }
   0xe   : > { %s83_s8 = ssub.s32 %s1778_s28, %s1852_s30  ;;  %p96_p0 = scmp.ne.s32.totalorder %s1774_s27, %s1770_s26 }
   0xf   : > { %p84_p1 = scmp.eq.s32.totalorder %s83_s8, 0  ;;  %p97_p2 = scmp.eq.s32.totalorder %s1848_s0, 1 }
  0x10   : > { %p102_p3 = scmp.ne.s32.totalorder %s1770_s26, %s1766_s25  ;;  %p103_p4 = scmp.eq.s32.totalorder %s1501_s29, 1 }
  0x11   : > { %s1863_s9 = scalar_select %p84_p1, %s1774_s27, %s86_s7  }
  0x12   : > { %p1865_p5 = por %p97_p2, %p96_p0  ;;  %p1869_p6 = por %p103_p4, %p102_p3 }
  0x13   : > { %p1502_p7 = scmp.ge.s32.totalorder %s1778_s28, 1  ;;  %p136_p8 = scmp.lt.s32.totalorder %s1778_s28, 3 }
  0x14   : > { %p1558_p9 = scmp.eq.s32.totalorder %s1848_s0, 0  ;;  %s148_s14 = sshll.u32 %s2080_s1, 4  ;;  %s149_s14 = int_to_ptr.hbm [resolvable:$true] %s148_s14 }
  0x15   : > { %p137_p10 = pnand %p1502_p7, %p136_p8  ;;  %s1781_s15 = smov [#allocation7]  }
  0x16   : > { %s150_s16 = sshll.u32 %s1781_s15, 4  ;;  %s151_s16 = int_to_ptr.vmem [resolvable:$true] %s150_s16 }
  0x17   : > { %p1547_p11 = pneg %p137_p10  ;;  %170 = sbr.rel (%p137_p10) target bundleno = 403 (0x193), region = 28 }
  0x19   : > { %p1548_p12 = pnand %p1558_p9, %p1547_p11 }
  0x1b   : > { %1550 = dma.hbm_to_vmem [thread:$0]  (!%p1548_p12), %s149_s14, 16, %s151_s16, [#allocation8]  }
  0x1c   : > { %1721 = dma.done.wait (%p1558_p9), [#allocation8], 16  }
  0x1d   : > { %1723 = vsyncadd (%p1558_p9), [#allocation8], 4294967280  ;;  %s1880_s17 = sshll.u32 %s1848_s0, 3  ;;  %s1883_s18 = sand.u32 1, %s1770_s26  }
  0x1e   : > { %s204_s19 = sld [smem:[#allocation6 + %s1880_s17]]  ;;  %s1507_s20 = sshll.u32 %s1883_s18, 3 }
  0x1f   : > { %p199_p13 = scmp.lt.s32.totalorder %s1848_s0, 1  ;;  %s1897_s12 = scalar_lea.vmem [#allocation10], %s1507_s20 }
  0x20   : > { %s1899_s13 = scalar_lea.vmem [#allocation11], %s1507_s20 }
  0x21   : > { %s2093_s0 = smov (!%p199_p13, %s1848_s0), 1 }
  0x22   : > { %s1509_s21 = sshll.u32 %s2093_s0, 3 }
  0x23   : > { %s1895_s8 = scalar_lea.vmem %s2081_s2, %s1509_s21 }
  0x24   : > { %s205_s24 = scalar_lea.vmem %s2082_s3, %s204_s19 }
  0x25   : > { %v220_v0 = vld [vmem:[%s205_s24] sm:$0x1] }
  0x26   : > { %221 = vst [vmem:[#allocation2] sm:$0x1] %v220_v0 }
  0x27   : > { %239 = vsyncadd [#allocation4], 16  ;;  %s240_s0 = scalar_lea.vmem %s2083_s4, %s204_s19 }
  0x28   : > { %v256_v1 = vld [vmem:[%s240_s0] sm:$0x1] }
  0x29   : > { %257 = vst [vmem:[#allocation3] sm:$0x1] %v256_v1 }
  0x2a   : > { %275 = vsyncadd [#allocation4 + $0x8], 16  ;;  %s276_s16 = sadd.s32 1, %s1880_s17 }
  0x2b   : > { %s277_s22 = sld [smem:[#allocation6 + %s276_s16]] }
  0x31   : > { %s278_s24 = scalar_lea.vmem %s2082_s3, %s277_s22 }
  0x32   : > { %v295_v2 = vld [vmem:[%s278_s24] sm:$0x1] }
  0x33   : > { %296 = vst [vmem:[#allocation2 + $0x1] sm:$0x1] %v295_v2 }
  0x34   : > { %314 = vsyncadd [#allocation4 + $0x1], 16  ;;  %s315_s7 = scalar_lea.vmem %s2083_s4, %s277_s22 }
  0x35   : > { %v332_v3 = vld [vmem:[%s315_s7] sm:$0x1] }
  0x36   : > { %333 = vst [vmem:[#allocation3 + $0x1] sm:$0x1] %v332_v3 }
  0x37   : > { %351 = vsyncadd [#allocation4 + $0x9], 16  ;;  %s352_s19 = sadd.s32 2, %s1880_s17 }
  0x38   : > { %s353_s14 = sld [smem:[#allocation6 + %s352_s19]] }
  0x3e   : > { %s354_s16 = scalar_lea.vmem %s2082_s3, %s353_s14 }
  0x3f   : > { %v371_v4 = vld [vmem:[%s354_s16] sm:$0x1] }
  0x40   : > { %372 = vst [vmem:[#allocation2 + $0x2] sm:$0x1] %v371_v4 }
  0x41   : > { %390 = vsyncadd [#allocation4 + $0x2], 16  ;;  %s391_s24 = scalar_lea.vmem %s2083_s4, %s353_s14 }
  0x42   : > { %v408_v5 = vld [vmem:[%s391_s24] sm:$0x1] }
  0x43   : > { %409 = vst [vmem:[#allocation3 + $0x2] sm:$0x1] %v408_v5 }
  0x44   : > { %427 = vsyncadd [#allocation4 + $0xa], 16  ;;  %s428_s22 = sadd.s32 3, %s1880_s17 }
  0x45   : > { %s429_s20 = sld [smem:[#allocation6 + %s428_s22]] }
  0x4b   : > { %s430_s19 = scalar_lea.vmem %s2082_s3, %s429_s20 }
  0x4c   : > { %v447_v6 = vld [vmem:[%s430_s19] sm:$0x1] }
  0x4d   : > { %448 = vst [vmem:[#allocation2 + $0x3] sm:$0x1] %v447_v6 }
  0x4e   : > { %466 = vsyncadd [#allocation4 + $0x3], 16  ;;  %s467_s16 = scalar_lea.vmem %s2083_s4, %s429_s20 }
  0x4f   : > { %v484_v7 = vld [vmem:[%s467_s16] sm:$0x1] }
  0x50   : > { %485 = vst [vmem:[#allocation3 + $0x3] sm:$0x1] %v484_v7 }
  0x51   : > { %503 = vsyncadd [#allocation4 + $0xb], 16  ;;  %s504_s14 = sadd.s32 4, %s1880_s17 }
  0x52   : > { %s505_s23 = sld [smem:[#allocation6 + %s504_s14]] }
  0x58   : > { %s506_s22 = scalar_lea.vmem %s2082_s3, %s505_s23 }
  0x59   : > { %v523_v8 = vld [vmem:[%s506_s22] sm:$0x1] }
  0x5a   : > { %524 = vst [vmem:[#allocation2 + $0x4] sm:$0x1] %v523_v8 }
  0x5b   : > { %542 = vsyncadd [#allocation4 + $0x4], 16  ;;  %s543_s19 = scalar_lea.vmem %s2083_s4, %s505_s23 }
  0x5c   : > { %v560_v9 = vld [vmem:[%s543_s19] sm:$0x1] }
  0x5d   : > { %561 = vst [vmem:[#allocation3 + $0x4] sm:$0x1] %v560_v9 }
  0x5e   : > { %579 = vsyncadd [#allocation4 + $0xc], 16  ;;  %s580_s20 = sadd.s32 5, %s1880_s17 }
  0x5f   : > { %s581_s15 = sld [smem:[#allocation6 + %s580_s20]] }
  0x65   : > { %s582_s14 = scalar_lea.vmem %s2082_s3, %s581_s15 }
  0x66   : > { %v599_v10 = vld [vmem:[%s582_s14] sm:$0x1] }
  0x67   : > { %600 = vst [vmem:[#allocation2 + $0x5] sm:$0x1] %v599_v10 }
  0x68   : > { %618 = vsyncadd [#allocation4 + $0x5], 16  ;;  %s619_s22 = scalar_lea.vmem %s2083_s4, %s581_s15 }
  0x69   : > { %v636_v11 = vld [vmem:[%s619_s22] sm:$0x1] }
  0x6a   : > { %637 = vst [vmem:[#allocation3 + $0x5] sm:$0x1] %v636_v11 }
  0x6b   : > { %655 = vsyncadd [#allocation4 + $0xd], 16  ;;  %s656_s23 = sadd.s32 6, %s1880_s17 }
  0x6c   : > { %s657_s29 = sld [smem:[#allocation6 + %s656_s23]] }
  0x72   : > { %s658_s20 = scalar_lea.vmem %s2082_s3, %s657_s29 }
  0x73   : > { %v675_v12 = vld [vmem:[%s658_s20] sm:$0x1] }
  0x74   : > { %676 = vst [vmem:[#allocation2 + $0x6] sm:$0x1] %v675_v12 }
  0x75   : > { %694 = vsyncadd [#allocation4 + $0x6], 16  ;;  %s695_s14 = scalar_lea.vmem %s2083_s4, %s657_s29 }
  0x76   : > { %v712_v13 = vld [vmem:[%s695_s14] sm:$0x1] }
  0x77   : > { %713 = vst [vmem:[#allocation3 + $0x6] sm:$0x1] %v712_v13 }
  0x78   : > { %731 = vsyncadd [#allocation4 + $0xe], 16  ;;  %s732_s15 = sadd.s32 7, %s1880_s17 }
  0x79   : > { %s733_s21 = sld [smem:[#allocation6 + %s732_s15]] }
  0x7f   : > { %s734_s23 = scalar_lea.vmem %s2082_s3, %s733_s21 }
  0x80   : > { %v751_v14 = vld [vmem:[%s734_s23] sm:$0x1] }
  0x81   : > { %752 = vst [vmem:[#allocation2 + $0x7] sm:$0x1] %v751_v14 }
  0x82   : > { %770 = vsyncadd [#allocation4 + $0x7], 16  ;;  %s771_s20 = scalar_lea.vmem %s2083_s4, %s733_s21  ;;  %v809_v16 = vld [vmem:[%s1895_s8] sm:$0xff]  ;;  %v1782_v17 = vmov 0  }
  0x83   : > { %v788_v15 = vld [vmem:[%s771_s20] sm:$0x1]  ;;  %1602 = vset.pattern.permute.xlu0 %v1782_v17 }
  0x84   : > { %789 = vst [vmem:[#allocation3 + $0x7] sm:$0x1] %v788_v15  ;;  %815 = vperm.xlu0 %1602, %v809_v16  }
  0x85   : > { %807 = vsyncadd [#allocation4 + $0xf], 16  ;;  %v1603_v18 = vld [vmem:[#allocation7] ss:$0 sm:$0xff]  ;;  %v1783_v32 = vmov 683565275  }
  0x86   : > { %v1784_v34 = vmov 2475754826   ;;  %v1785_v37 = vmov 2131351028   ;;  %v1786_v40 = vmov 2102212464  }
  0x87   : > { %v1787_v43 = vmov 920167782   ;;  %v1788_v46 = vmov 1326507024  }
  0xf6   : > { %v816_v19 = vpop.permute.xlu0 %815 }
  0xf7   : > { %v1955_v20 = vmul.f32 %v1603_v18, %v816_v19 }
  0xf9   : > { %v822_v21 = vand.u32 2139095040, %v1955_v20  ;;  %v819_v24 = vand.u32 2147483647, %v1955_v20  ;;  %vm821_vm12 = vcmp.lt.s32.totalorder %v1955_v20, 0 }
  0xfb   : > { %v823_v22 = vshrl.u32 %v822_v21, 23  ;;  %v826_v26 = vand.u32 8388607, %v819_v24  ;;  %vm820_vm13 = vcmp.le.f32.partialorder %v819_v24, 0.7853982 }
  0xfd   : > { %v1511_v23 = vadd.s32 4294967169, %v823_v22  ;;  %v827_v30 = vor.u32 8388608, %v826_v26 }
  0xff   : > { %v829_v25 = vadd.s32 1, %v1511_v23  ;;  %v1972_v53 = vshll.u32 %v827_v30, 8 }
 0x101   : > { %vm830_vm0 = vcmp.gt.s32.totalorder %v829_v25, 0  ;;  %v868_v62 = vand.u32 65535, %v1972_v53  ;;  %v869_v63 = vshrl.u32 %v1972_v53, 16 }
 0x102   : > { %v831_v27 = vsel %vm830_vm0, %v829_v25, 0 }
 0x103   : > { %v833_v28 = vand.u32 31, %v831_v27  ;;  %v1963_v31 = vshrl.u32 %v831_v27, 5 }
 0x105   : > { %v1961_v29 = vsub.s32 32, %v833_v28  ;;  %v836_v33 = vshll.u32 %v1783_v32, %v833_v28  ;;  %v839_v35 = vshll.u32 %v1784_v34, %v833_v28  ;;  %v842_v39 = vshll.u32 %v1785_v37, %v833_v28 }
 0x106   : > { %v845_v42 = vshll.u32 %v1786_v40, %v833_v28  ;;  %v848_v45 = vshll.u32 %v1787_v43, %v833_v28  ;;  %vm851_vm1 = vcmp.lt.s32.totalorder %v1963_v31, 1  ;;  %vm854_vm2 = vcmp.lt.s32.totalorder %v1963_v31, 4 }
 0x107   : > { %v837_v36 = vshrl.u32 %v1784_v34, %v1961_v29  ;;  %v840_v38 = vshrl.u32 %v1785_v37, %v1961_v29  ;;  %v843_v41 = vshrl.u32 %v1786_v40, %v1961_v29  ;;  %v846_v44 = vshrl.u32 %v1787_v43, %v1961_v29 }
 0x108   : > { %v849_v47 = vshrl.u32 %v1788_v46, %v1961_v29  ;;  %vm853_vm3 = vcmp.lt.s32.totalorder %v1963_v31, 3  ;;  %vm852_vm4 = vcmp.lt.s32.totalorder %v1963_v31, 2  ;;  %v835_v27 = vshrl.u32 %v1783_v32, %v1961_v29 }
 0x109   : > { %v838_v48 = vor.u32 %v837_v36, %v836_v33  ;;  %v841_v49 = vor.u32 %v840_v38, %v839_v35  ;;  %v844_v50 = vor.u32 %v843_v41, %v842_v39  ;;  %v847_v51 = vor.u32 %v846_v44, %v845_v42 }
 0x10a   : > { %v850_v52 = vor.u32 %v849_v47, %v848_v45 }
 0x10b   : > { %v859_v54 = vsel %vm851_vm1, %v838_v48, %v841_v49  ;;  %v863_v55 = vsel %vm851_vm1, %v841_v49, %v844_v50  ;;  %v860_v56 = vsel %vm854_vm2, %v847_v51, 920167782  ;;  %v856_v23 = vsel %vm854_vm2, %v844_v50, 2102212464 }
 0x10c   : > { %v864_v57 = vsel %vm854_vm2, %v850_v52, 1326507024  ;;  %v861_v58 = vsel %vm853_vm3, %v844_v50, %v860_v56  ;;  %v855_v36 = vsel %vm851_vm1, %v835_v27, %v838_v48  ;;  %v857_v37 = vsel %vm853_vm3, %v841_v49, %v856_v23 }
 0x10d   : > { %v865_v59 = vsel %vm853_vm3, %v847_v51, %v864_v57  ;;  %v862_v60 = vsel %vm852_vm4, %v859_v54, %v861_v58  ;;  %v858_v29 = vsel %vm852_vm4, %v855_v36, %v857_v37 }
 0x10e   : > { %v866_v61 = vsel %vm852_vm4, %v863_v55, %v865_v59  ;;  %v892_v2 = vand.u32 65535, %v862_v60  ;;  %v893_v3 = vshrl.u32 %v862_v60, 16  ;;  %v912_v44 = vmul.u32 %v1972_v53, %v858_v29 }
 0x10f   : > { %v870_v0 = vand.u32 65535, %v866_v61  ;;  %v871_v1 = vshrl.u32 %v866_v61, 16  ;;  %vm962_vm4 = vweird.f32 %v1955_v20 }
 0x110   : > { %v895_v6 = vmul.u32 %v893_v3, %v868_v62  ;;  %v896_v7 = vmul.u32 %v892_v2, %v869_v63  ;;  %v894_v11 = vmul.u32 %v892_v2, %v868_v62  ;;  %v897_v15 = vmul.u32 %v893_v3, %v869_v63 }
 0x111   : > { %v873_v4 = vmul.u32 %v871_v1, %v868_v62  ;;  %v874_v5 = vmul.u32 %v870_v0, %v869_v63  ;;  %v872_v8 = vmul.u32 %v870_v0, %v868_v62  ;;  %v875_v10 = vmul.u32 %v871_v1, %v869_v63 }
 0x112   : > { %v898_v12 = vshll.u32 %v895_v6, 16  ;;  %v900_v18 = vshll.u32 %v896_v7, 16  ;;  %v899_v34 = vshrl.u32 %v895_v6, 16  ;;  %v901_v40 = vshrl.u32 %v896_v7, 16 }
 0x113   : > { %v876_v9 = vshll.u32 %v873_v4, 16  ;;  %v878_v13 = vshll.u32 %v874_v5, 16  ;;  %v877_v28 = vshrl.u32 %v873_v4, 16  ;;  %v879_v38 = vshrl.u32 %v874_v5, 16 }
 0x114   : > { %vm902_vm6 = vc.u32 %v894_v11, %v898_v12  ;;  %v904_v19 = vadd.s32 %v898_v12, %v894_v11 }
 0x115   : > { %vm880_vm5 = vc.u32 %v872_v8, %v876_v9  ;;  %v882_v14 = vadd.s32 %v876_v9, %v872_v8  ;;  %v903_v22 = vsel %vm902_vm6, 1, %v1782_v17 }
 0x116   : > { %v881_v16 = vsel %vm880_vm5, 1, %v1782_v17  ;;  %v905_v26 = vadd.s32 %v903_v22, %v897_v15  ;;  %vm906_vm8 = vc.u32 %v904_v19, %v900_v18  ;;  %v908_v43 = vadd.s32 %v904_v19, %v900_v18 }
 0x117   : > { %v883_v21 = vadd.s32 %v881_v16, %v875_v10  ;;  %vm884_vm7 = vc.u32 %v882_v14, %v878_v13  ;;  %v907_v33 = vsel %vm906_vm8, 1, %v1782_v17 }
 0x118   : > { %v885_v25 = vsel %vm884_vm7, 1, %v1782_v17  ;;  %v909_v35 = vadd.s32 %v907_v33, %v905_v26 }
 0x119   : > { %v887_v30 = vadd.s32 %v885_v25, %v883_v21 }
 0x11a   : > { %v910_v41 = vadd.s32 %v909_v35, %v899_v34 }
 0x11b   : > { %v888_v39 = vadd.s32 %v887_v30, %v877_v28 }
 0x11c   : > { %v911_v32 = vadd.s32 %v910_v41, %v901_v40 }
 0x11d   : > { %v889_v42 = vadd.s32 %v888_v39, %v879_v38 }
 0x11e   : > { %v915_v17 = vadd.s32 1, %v911_v32 }
 0x11f   : > { %vm914_vm9 = vc.u32 %v889_v42, %v908_v43  ;;  %v913_v31 = vadd.s32 %v908_v43, %v889_v42 }
 0x120   : > { %v916_v45 = vsel %vm914_vm9, %v915_v17, %v911_v32 }
 0x121   : > { %v917_v46 = vadd.s32 %v916_v45, %v912_v44 }
 0x123   : > { %v918_v47 = vadd.s32 536870912, %v917_v46 }
 0x125   : > { %v919_v48 = vshrl.u32 %v918_v47, 30 }
 0x127   : > { %v920_v50 = vshll.u32 %v919_v48, 30  ;;  %v943_v5 = vsub.s32 4, %v919_v48 }
 0x129   : > { %v921_v49 = vsub.s32 %v917_v46, %v920_v50  ;;  %v944_v10 = vsel %vm821_vm12, %v943_v5, %v919_v48 }
 0x12a   : > { %v946_v13 = vsel %vm820_vm13, 0, %v944_v10 }
 0x12b   : > { %vm922_vm10 = vcmp.lt.s32.totalorder %v921_v49, 0  ;;  %v923_v51 = vsub.s32 0, %v921_v49  ;;  %v963_v19 = vadd.s32 3, %v946_v13  ;;  %v1118_v25 = vand.u32 3, %v946_v13 }
 0x12d   : > { %v924_v52 = vsel %vm922_vm10, %v923_v51, %v921_v49  ;;  %v964_v26 = vand.u32 3, %v963_v19  ;;  %vm1119_vm14 = vcmp.lt.s32.totalorder %v1118_v25, 2  ;;  %vm1120_vm15 = vcmp.eq.s32.totalorder %v1118_v25, 0 }
 0x12e   : > { %v925_v54 = vclz %v924_v52  ;;  %vm1123_vm3 = vcmp.eq.s32.totalorder %v1118_v25, 2 }
 0x12f   : > { %vm965_vm0 = vcmp.lt.s32.totalorder %v964_v26, 2  ;;  %vm966_vm1 = vcmp.eq.s32.totalorder %v964_v26, 0  ;;  %vm969_vm2 = vcmp.eq.s32.totalorder %v964_v26, 2 }
 0x130   : > { %v1512_v55 = vadd.s32 4294967294, %v925_v54 }
 0x132   : > { %vm1513_vm11 = vcmp.lt.s32.totalorder %v1512_v55, 0 }
 0x133   : > { %v928_v56 = vsel %vm1513_vm11, 0, %v1512_v55 }
 0x134   : > { %v929_v57 = vsub.s32 32, %v928_v56  ;;  %v933_v58 = vsub.s32 4294967266, %v928_v56  ;;  %v930_v59 = vshll.u32 %v921_v49, %v928_v56 }
 0x136   : > { %v931_v60 = vshrl.u32 %v913_v31, %v929_v57  ;;  %v934_v61 = vadd.s32 127, %v933_v58 }
 0x138   : > { %v932_v53 = vor.u32 %v931_v60, %v930_v59  ;;  %v935_v62 = vshll.u32 %v934_v61, 23 }
 0x13a   : > { %v936_v63 = vor.u32 4788187, %v935_v62  ;;  %v939_v1 = vcvt.s32.f32 %v932_v53 }
 0x13c   : > { %v937_v0 = vand.u32 2147483647, %v936_v63 }
 0x13e   : > { %v940_v2 = vmul.f32 %v939_v1, %v937_v0 }
 0x140   : > { %v941_v3 = vxor.u32 2147483648, %v940_v2 }
 0x142   : > { %v942_v4 = vsel %vm821_vm12, %v941_v3, %v940_v2 }
 0x143   : > { %v945_v6 = vsel %vm820_vm13, %v1955_v20, %v942_v4 }
 0x144   : > { %v947_v7 = vmul.f32 %v945_v6, %v945_v6 }
 0x146   : > { %v948_v8 = vmul.f32 -0.001358992, %v947_v7  ;;  %v955_v9 = vmul.f32 -0.00019511016, %v947_v7 }
 0x148   : > { %v949_v11 = vadd.f32 0.041655596, %v948_v8  ;;  %v956_v12 = vadd.f32 0.008332121, %v955_v9 }
 0x14a   : > { %v950_v14 = vmul.f32 %v949_v11, %v947_v7  ;;  %v957_v15 = vmul.f32 %v956_v12, %v947_v7 }
 0x14c   : > { %v951_v16 = vadd.f32 -0.4999988, %v950_v14  ;;  %v958_v18 = vadd.f32 -0.16666654, %v957_v15 }
 0x14e   : > { %v952_v21 = vmul.f32 %v951_v16, %v947_v7  ;;  %v959_v22 = vmul.f32 %v958_v18, %v947_v7 }
 0x150   : > { %v953_v23 = vadd.f32 1.0, %v952_v21  ;;  %v960_v24 = vadd.f32 1.0, %v959_v22 }
 0x152   : > { %v961_v27 = vmul.f32 %v960_v24, %v945_v6  ;;  %v970_v28 = vxor.u32 2147483648, %v953_v23 }
 0x154   : > { %v967_v30 = vxor.u32 2147483648, %v961_v27  ;;  %v971_v34 = vsel %vm969_vm2, %v970_v28, %v961_v27  ;;  %v1125_v36 = vsel %vm1123_vm3, %v970_v28, %v961_v27 }
 0x156   : > { %v968_v33 = vsel %vm966_vm1, %v953_v23, %v967_v30  ;;  %v1122_v35 = vsel %vm1120_vm15, %v953_v23, %v967_v30 }
 0x157   : > { %v972_v37 = vsel %vm965_vm0, %v968_v33, %v971_v34  ;;  %v1126_v38 = vsel %vm1119_vm14, %v1122_v35, %v1125_v36 }
 0x158   : > { %v973_v39 = vsel %vm962_vm4, nan, %v972_v37  ;;  %v1127_v40 = vsel %vm962_vm4, nan, %v1126_v38 }
 0x159   : > { %1724 = dma.done.wait [#allocation4], 16 }
 0x15a   : > { %1725 = vsyncadd [#allocation4], 4294967280 }
 0x15b   : > { %1726 = dma.done.wait [#allocation4 + $0x8], 16 }
 0x15c   : > { %1727 = vsyncadd [#allocation4 + $0x8], 4294967280 }
 0x15d   : > { %1728 = dma.done.wait [#allocation4 + $0x1], 16 }
 0x15e   : > { %1729 = vsyncadd [#allocation4 + $0x1], 4294967280 }
 0x15f   : > { %1730 = dma.done.wait [#allocation4 + $0x9], 16 }
 0x160   : > { %1731 = vsyncadd [#allocation4 + $0x9], 4294967280 }
 0x161   : > { %1732 = dma.done.wait [#allocation4 + $0x2], 16 }
 0x162   : > { %1733 = vsyncadd [#allocation4 + $0x2], 4294967280 }
 0x163   : > { %1734 = dma.done.wait [#allocation4 + $0xa], 16 }
 0x164   : > { %1735 = vsyncadd [#allocation4 + $0xa], 4294967280 }
 0x165   : > { %1736 = dma.done.wait [#allocation4 + $0x3], 16 }
 0x166   : > { %1737 = vsyncadd [#allocation4 + $0x3], 4294967280 }
 0x167   : > { %1738 = dma.done.wait [#allocation4 + $0xb], 16 }
 0x168   : > { %1739 = vsyncadd [#allocation4 + $0xb], 4294967280 }
 0x169   : > { %1740 = dma.done.wait [#allocation4 + $0x4], 16 }
 0x16a   : > { %1741 = vsyncadd [#allocation4 + $0x4], 4294967280 }
 0x16b   : > { %1742 = dma.done.wait [#allocation4 + $0xc], 16 }
 0x16c   : > { %1743 = vsyncadd [#allocation4 + $0xc], 4294967280 }
 0x16d   : > { %1744 = dma.done.wait [#allocation4 + $0x5], 16 }
 0x16e   : > { %1745 = vsyncadd [#allocation4 + $0x5], 4294967280 }
 0x16f   : > { %1746 = dma.done.wait [#allocation4 + $0xd], 16 }
 0x170   : > { %1747 = vsyncadd [#allocation4 + $0xd], 4294967280 }
 0x171   : > { %1748 = dma.done.wait [#allocation4 + $0x6], 16 }
 0x172   : > { %1749 = vsyncadd [#allocation4 + $0x6], 4294967280 }
 0x173   : > { %1750 = dma.done.wait [#allocation4 + $0xe], 16 }
 0x174   : > { %1751 = vsyncadd [#allocation4 + $0xe], 4294967280 }
 0x175   : > { %1752 = dma.done.wait [#allocation4 + $0x7], 16 }
 0x176   : > { %1753 = vsyncadd [#allocation4 + $0x7], 4294967280 }
 0x177   : > { %1754 = dma.done.wait [#allocation4 + $0xf], 16 }
 0x178   : > { %1755 = vsyncadd [#allocation4 + $0xf], 4294967280  ;;  %s1187_s0 = scalar_lea.hbm %s2084_s5, %s1880_s17  ;;  %s1201_s15 = scalar_lea.hbm %s2085_s6, %s1880_s17  ;;  %v1161_v20 = vld [vmem:[#allocation2] sm:$0xff]  ;;  %v1162_v41 = vld [vmem:[#allocation3] sm:$0xff] }
 0x179   : > { %s1189_s21 = sshll.u32 %s1897_s12, 4  ;;  %s2024_s24 = sshll.u32 %s1187_s0, 4  ;;  %v1163_v42 = vmul.f32 %v1161_v20, %v1127_v40  ;;  %v1164_v43 = vmul.f32 %v1162_v41, %v973_v39  ;;  %v1167_v29 = vmul.f32 %v1162_v41, %v1127_v40  ;;  %v1168_v32 = vmul.f32 %v1161_v20, %v973_v39  ;;  %s1190_s21 = int_to_ptr.vmem [resolvable:$true] %s1189_s21  ;;  %s1192_s24 = int_to_ptr.hbm [resolvable:$true] %s2024_s24 }
 0x17a   : > { %s1203_s22 = sshll.u32 %s1899_s13, 4  ;;  %s2027_s23 = sshll.u32 %s1201_s15, 4  ;;  %s2030_s22 = int_to_ptr.vmem [resolvable:$true] %s1203_s22  ;;  %s1206_s23 = int_to_ptr.hbm [resolvable:$true] %s2027_s23 }
 0x17b   : > { %v1165_v17 = vsub.f32 %v1163_v42, %v1164_v43  ;;  %v1169_v44 = vadd.f32 %v1168_v32, %v1167_v29  ;;  %s1172_s17 = scalar_lea.sflag [#allocation9], %s1883_s18  ;;  %s1660_s7 = sshra.s32 %s1192_s24, 4  ;;  %s1661_s7 = int_to_ptr.hbm [resolvable:$true] %s1660_s7 }
 0x17c   : > { %s1662_s19 = scalar_lea.hbm %s1661_s7, 8  ;;  %s1666_s29 = scalar_lea.hbm %s2084_s5, 16 }
 0x17d   : > { %1166 = vst [vmem:[%s1897_s12] sm:$0xff] %v1165_v17  ;;  %p1663_p0 = scmp.ne.s32.totalorder %s1661_s7, %s1662_s19  ;;  %p1667_p3 = scmp.lt.s32.totalorder %s1661_s7, %s2084_s5 }
 0x17e   : > { %1170 = vst [vmem:[%s1899_s13] sm:$0xff] %v1169_v44  ;;  %p1668_p4 = scmp.lt.s32.totalorder %s1666_s29, %s1662_s19 }
 0x17f   : > { %p1664_p1 = pnand %p1663_p0, %p1865_p5 }
 0x180   : > { %p1669_p7 = por %p1668_p4, %p1667_p3 }
 0x181   : > { %p1665_p2 = pneg %p1664_p1 }
 0x183   : > { %p1670_p8 = pnand %p1669_p7, %p1665_p2 }
 0x185   : > { %1673 = shalt.err (!%p1670_p8)
}
 0x186   : > { %1543 = dma.vmem_to_hbm [thread:$0]  (%p1865_p5), %s1190_s21, 128, %s1192_s24, %s1172_s17  }
 0x187   : > { %s1177_s12 = scalar_lea.sflag [#allocation12], %s1883_s18  ;;  %s1688_s13 = sshra.s32 %s1206_s23, 4  ;;  %s1689_s13 = int_to_ptr.hbm [resolvable:$true] %s1688_s13 }
 0x188   : > { %s1690_s14 = scalar_lea.hbm %s1689_s13, 8  ;;  %s1694_s19 = scalar_lea.hbm %s2085_s6, 16 }
 0x189   : > { %p1691_p9 = scmp.ne.s32.totalorder %s1689_s13, %s1690_s14  ;;  %p1695_p12 = scmp.lt.s32.totalorder %s1689_s13, %s2085_s6 }
 0x18a   : > { %p1696_p13 = scmp.lt.s32.totalorder %s1694_s19, %s1690_s14 }
 0x18b   : > { %p1692_p10 = pnand %p1691_p9, %p1865_p5 }
 0x18c   : > { %p1697_p0 = por %p1696_p13, %p1695_p12 }
 0x18d   : > { %p1693_p11 = pneg %p1692_p10 }
 0x18f   : > { %p1698_p1 = pnand %p1697_p0, %p1693_p11 }
 0x191   : > { %1701 = shalt.err (!%p1698_p1)
}
 0x192   : > { %1544 = dma.vmem_to_hbm [thread:$0]  (%p1865_p5), %s2030_s22, 128, %s1206_s23, %s1177_s12  }
 0x193 PF: > { %p1560_p2 = scmp.ge.s32.totalorder %s1778_s28, 2  ;;  %s1217_s18 = sand.u32 1, %s1766_s25  }
 0x194   : > { %s1218_s21 = scalar_lea.sflag [#allocation9], %s1217_s18 }
 0x195   : > { %p1552_p3 = pnand %p1560_p2, %p1869_p6 }
 0x197   : > { %p1553_p4 = pneg %p1552_p3 }
 0x199   : > { %1757 = dma.done.wait (%p1553_p4), %s1218_s21, 128  }
 0x19a   : > { %1759 = vsyncadd (%p1553_p4), %s1218_s21, 4294967168  ;;  %s1228_s24 = scalar_lea.sflag [#allocation12], %s1217_s18 }
 0x19b   : > { %1761 = dma.done.wait (%p1553_p4), %s1228_s24, 128  }
 0x19c   : > { %1763 = vsyncadd (%p1553_p4), %s1228_s24, 4294967168  ;;  %p29_p5 = scmp.ge.s32.totalorder %s1852_s30, 4   ;;  %s2088_s25 = smov %s1770_s26 }
 0x19d   : > { %s2089_s26 = smov %s1774_s27  ;;  %s2090_s27 = smov %s1863_s9 }
 0x19e   : > { %s2091_s28 = smov %s1852_s30  ;;  %31 = sbr.rel (!%p29_p5) target bundleno = 12 (0xc), region = 689 }
 0x1a3   :  { %1234 = vsyncpa [#allocation8], 1 }
 0x1a4   :  { %1236 = vsyncpa [#allocation8 + $0x1], 1 }
 0x1a5   :  { %1237 = vsyncpa [#allocation9], 1 }
 0x1a6   :  { %1239 = vsyncpa [#allocation9 + $0x1], 1 }
 0x1a7   :  { %1240 = vsyncpa [#allocation12], 1 }
 0x1a8   :  { %1242 = vsyncpa [#allocation12 + $0x1], 1 }
 0x1a9   :  { %1243 = vsyncmov [#allocation4] }
 0x1ac   :  { %s1244_s28 = vpop.sfrf %1243 }
 0x1ad   :  { %p1523_p6 = scmp.ne.s32.totalorder %s1244_s28, 0 }
 0x1af   :  { %1248 = shalt.err (%p1523_p6)  }
 0x1b0   :  { %1250 = vsyncmov [#allocation4 + $0x1] }
 0x1b3   :  { %s1251_s10 = vpop.sfrf %1250 }
 0x1b4   :  { %p1524_p7 = scmp.ne.s32.totalorder %s1251_s10, 0 }
 0x1b6   :  { %1255 = shalt.err (%p1524_p7)  }
 0x1b7   :  { %1257 = vsyncmov [#allocation4 + $0x2] }
 0x1ba   :  { %s1258_s11 = vpop.sfrf %1257 }
 0x1bb   :  { %p1525_p8 = scmp.ne.s32.totalorder %s1258_s11, 0 }
 0x1bd   :  { %1262 = shalt.err (%p1525_p8)  }
 0x1be   :  { %1264 = vsyncmov [#allocation4 + $0x3] }
 0x1c1   :  { %s1265_s30 = vpop.sfrf %1264 }
 0x1c2   :  { %p1526_p9 = scmp.ne.s32.totalorder %s1265_s30, 0 }
 0x1c4   :  { %1269 = shalt.err (%p1526_p9)  }
 0x1c5   :  { %1271 = vsyncmov [#allocation4 + $0x4] }
 0x1c8   :  { %s1272_s1 = vpop.sfrf %1271 }
 0x1c9   :  { %p1527_p10 = scmp.ne.s32.totalorder %s1272_s1, 0 }
 0x1cb   :  { %1276 = shalt.err (%p1527_p10)  }
 0x1cc   :  { %1278 = vsyncmov [#allocation4 + $0x5] }
 0x1cf   :  { %s1279_s2 = vpop.sfrf %1278 }
 0x1d0   :  { %p1528_p11 = scmp.ne.s32.totalorder %s1279_s2, 0 }
 0x1d2   :  { %1283 = shalt.err (%p1528_p11)  }
 0x1d3   :  { %1285 = vsyncmov [#allocation4 + $0x6] }
 0x1d6   :  { %s1286_s3 = vpop.sfrf %1285 }
 0x1d7   :  { %p1529_p12 = scmp.ne.s32.totalorder %s1286_s3, 0 }
 0x1d9   :  { %1290 = shalt.err (%p1529_p12)  }
 0x1da   :  { %1292 = vsyncmov [#allocation4 + $0x7] }
 0x1dd   :  { %s1293_s4 = vpop.sfrf %1292 }
 0x1de   :  { %p1530_p13 = scmp.ne.s32.totalorder %s1293_s4, 0 }
 0x1e0   :  { %1297 = shalt.err (%p1530_p13)  }
 0x1e1   :  { %1299 = vsyncmov [#allocation4 + $0x8] }
 0x1e4   :  { %s1300_s5 = vpop.sfrf %1299 }
 0x1e5   :  { %p1531_p0 = scmp.ne.s32.totalorder %s1300_s5, 0 }
 0x1e7   :  { %1304 = shalt.err (%p1531_p0)  }
 0x1e8   :  { %1306 = vsyncmov [#allocation4 + $0x9] }
 0x1eb   :  { %s1307_s6 = vpop.sfrf %1306 }
 0x1ec   :  { %p1532_p1 = scmp.ne.s32.totalorder %s1307_s6, 0 }
 0x1ee   :  { %1311 = shalt.err (%p1532_p1)  }
 0x1ef   :  { %1313 = vsyncmov [#allocation4 + $0xa] }
 0x1f2   :  { %s1314_s25 = vpop.sfrf %1313 }
 0x1f3   :  { %p1533_p2 = scmp.ne.s32.totalorder %s1314_s25, 0 }
 0x1f5   :  { %1318 = shalt.err (%p1533_p2)  }
 0x1f6   :  { %1320 = vsyncmov [#allocation4 + $0xb] }
 0x1f9   :  { %s1321_s26 = vpop.sfrf %1320 }
 0x1fa   :  { %p1534_p3 = scmp.ne.s32.totalorder %s1321_s26, 0 }
 0x1fc   :  { %1325 = shalt.err (%p1534_p3)  }
 0x1fd   :  { %1327 = vsyncmov [#allocation4 + $0xc] }
 0x200   :  { %s1328_s27 = vpop.sfrf %1327 }
 0x201   :  { %p1535_p4 = scmp.ne.s32.totalorder %s1328_s27, 0 }
 0x203   :  { %1332 = shalt.err (%p1535_p4)  }
 0x204   :  { %1334 = vsyncmov [#allocation4 + $0xd] }
 0x207   :  { %s1335_s9 = vpop.sfrf %1334 }
 0x208   :  { %p1536_p5 = scmp.ne.s32.totalorder %s1335_s9, 0 }
 0x20a   :  { %1339 = shalt.err (%p1536_p5)  }
 0x20b   :  { %1341 = vsyncmov [#allocation4 + $0xe] }
 0x20e   :  { %s1342_s22 = vpop.sfrf %1341 }
 0x20f   :  { %p1537_p6 = scmp.ne.s32.totalorder %s1342_s22, 0 }
 0x211   :  { %1346 = shalt.err (%p1537_p6)  }
 0x212   :  { %1348 = vsyncmov [#allocation4 + $0xf] }
 0x215   :  { %s1349_s23 = vpop.sfrf %1348 }
 0x216   :  { %p1538_p7 = scmp.ne.s32.totalorder %s1349_s23, 0 }
 0x218   :  { %1353 = shalt.err (%p1538_p7)  }

</bundles_post_ra>
